<compile_context>
chip_gen: v7x
topology: tpu7x:2x2x1
jax: 0.10.0
libtpu: 0.0.40
codegen_flags: <defaults>
</compile_context>

<pallas_src>
import functools

import jax
import jax.numpy as jnp
from jax.experimental import pallas as pl
from jax.experimental.pallas import tpu as pltpu


# ----------------------------------------------------------------------------
# VMEM sizing helper (per review: size vmem_limit_bytes from the block shapes).
# ----------------------------------------------------------------------------
def _bytes(shape, dtype=jnp.float32):
    n = 1
    for d in shape:
        n *= int(d)
    return n * jnp.dtype(dtype).itemsize


def _vmem_limit(block_shapes, scratch_shapes=()):
    need = 2 * sum(_bytes(s) for s in block_shapes)      # double-buffered blocks
    need += sum(_bytes(s) for s in scratch_shapes)
    return int(min(max(2 * need + (4 << 20), 32 << 20), 100 << 20))


def _lane_tile(p, target=4096):
    """Largest multiple-of-128 divisor of p that is <= target (else p itself)."""
    if p <= target or p % 128 != 0:
        return p
    t = target - target % 128
    while p % t:
        t -= 128
    return t


def _h_tile(h, target=128):
    """Largest multiple-of-8 divisor of h that is <= target (else h itself)."""
    if h <= target or h % 8 != 0:
        return h
    t = target - target % 8
    while h % t:
        t -= 8
    return t


# ----------------------------------------------------------------------------
# Kernel 1: 1x1-conv classification head, gridded over (batch, lane tiles).
#   out[b, k, p] = sum_c W[k, c] * feat[b, c, p] + bias[k]
# ----------------------------------------------------------------------------
def _head_kernel(w_ref, b_ref, x_ref, o_ref):
    # w: (K, C) resident, b: (K, 1) resident, x: (1, C, TP), o: (1, K, TP)
    o_ref[0] = (jnp.dot(w_ref[...], x_ref[0], preferred_element_type=jnp.float32)
                + b_ref[...])


def conv1x1_head(w, bias, feat):
    """feat: (B, C, Hs, Ws) -> scores_small: (B, K, Hs, Ws).  No XLA transposes."""
    B, C, Hs, Ws = feat.shape
    K = w.shape[0]
    P = Hs * Ws
    TP = _lane_tile(P)
    x = feat.reshape(B, C, P)                              # free (contiguous)
    blocks = [(K, C), (K, 1), (1, C, TP), (1, K, TP)]
    out = pl.pallas_call(
        _head_kernel,
        out_shape=jax.ShapeDtypeStruct((B, K, P), jnp.float32),
        grid=(B, P // TP),
        in_specs=[
            pl.BlockSpec((K, C), lambda b, p: (0, 0)),      # resident weight
            pl.BlockSpec((K, 1), lambda b, p: (0, 0)),      # resident bias
            pl.BlockSpec((1, C, TP), lambda b, p: (b, 0, p)),
        ],
        out_specs=pl.BlockSpec((1, K, TP), lambda b, p: (b, 0, p)),
        compiler_params=pltpu.CompilerParams(
            dimension_semantics=("parallel", "parallel"),
            vmem_limit_bytes=_vmem_limit(blocks)),
    )(w, bias.reshape(K, 1), x)
    return out.reshape(B, K, Hs, Ws)                        # free (contiguous)


# ----------------------------------------------------------------------------
# Kernel 2 (pass 1): H-tiled bilinear upsample (align_corners=True) + LayerNorm
# statistics.  Grid (B, H-tiles); H-tile axis carries the stats accumulator.
# ----------------------------------------------------------------------------
def _upsample_stats_kernel(a_ref, bmT_ref, s_ref, org_ref, stats_ref, u_ref):
    ht = pl.program_id(1)
    K = org_ref.shape[1]
    Hs = a_ref.shape[1]

    @pl.when(ht == 0)
    def _():
        # Width interp once per batch: (K*Hs, Ws) @ (Ws, W) -> (K*Hs, W),
        # lane-dense contraction over Ws; reused by every H-tile of this batch.
        # TODO(synk): if VMEM is tight on v7x, compute this per-k inside the loop
        #             instead of materializing the full (K*Hs, W) scratch.
        u_ref[...] = jnp.dot(s_ref[0], bmT_ref[...],
                             preferred_element_type=jnp.float32)
        stats_ref[...] = jnp.zeros_like(stats_ref)

    a = a_ref[...]                                          # (TH, Hs)
    part_sum = jnp.float32(0.0)
    part_sq = jnp.float32(0.0)
    # Height interp: K shared-A 2-D matmuls written straight into the output
    # tile.  The LayerNorm statistics accumulate inside the loop so the
    # VALU/XLU reductions co-issue with the MXU matmuls (no serial tail, no
    # re-read of the (K,TH,W) block).
    for k in range(K):
        blk = jnp.dot(a, u_ref[k * Hs:(k + 1) * Hs, :],
                      preferred_element_type=jnp.float32)   # (TH, W)
        org_ref[0, k] = blk
        part_sum = part_sum + jnp.sum(blk)
        part_sq = part_sq + jnp.sum(blk * blk)
    stats_ref[0, 0:1, :] = stats_ref[0, 0:1, :] + part_sum
    stats_ref[0, 1:2, :] = stats_ref[0, 1:2, :] + part_sq


# ----------------------------------------------------------------------------
# Kernel 3 (pass 2): normalize tiles with the per-batch statistics.
# Matches nn.LayerNorm(scores.size()[1:], eps=0, elementwise_affine=False).
# ----------------------------------------------------------------------------
def _normalize_kernel(stats_ref, org_ref, out_ref, *, inv_n):
    s = stats_ref[0, 0, 0]
    sq = stats_ref[0, 1, 0]
    mean = s * inv_n
    var = sq * inv_n - mean * mean
    # NOTE: eps=0 -> var==0 yields inf/nan exactly like the PyTorch module.
    # rsqrt goes to the EUP slot.
    out_ref[0] = (org_ref[0] - mean) * jax.lax.rsqrt(var)


def upsample_and_layernorm(scores_small, out_h, out_w, tile_h=None):
    """scores_small: (B, K, Hs, Ws) -> (score_org, scores), each (B, K, H, W)."""
    B, K, Hs, Ws = scores_small.shape
    TH = _h_tile(out_h) if tile_h is None else tile_h
    assert out_h % TH == 0
    HT = out_h // TH

    A = _interp_matrix(out_h, Hs)                           # (H, Hs)
    BmT = _interp_matrix(out_w, Ws).T                       # (Ws, W), pre-transposed
    s2 = scores_small.reshape(B, K * Hs, Ws)                # free (contiguous)

    org_block = pl.BlockSpec((1, K, TH, out_w), lambda b, h: (b, 0, h, 0))
    stats_block = pl.BlockSpec((1, 2, 128), lambda b, h: (b, 0, 0))

    p1_blocks = [(TH, Hs), (Ws, out_w), (1, K * Hs, Ws),
                 (1, K, TH, out_w), (1, 2, 128)]
    score_org, stats = pl.pallas_call(
        _upsample_stats_kernel,
        out_shape=(jax.ShapeDtypeStruct((B, K, out_h, out_w), jnp.float32),
                   jax.ShapeDtypeStruct((B, 2, 128), jnp.float32)),
        grid=(B, HT),
        in_specs=[
            pl.BlockSpec((TH, Hs), lambda b, h: (h, 0)),         # A tile
            pl.BlockSpec((Ws, out_w), lambda b, h: (0, 0)),      # resident BmT
            pl.BlockSpec((1, K * Hs, Ws), lambda b, h: (b, 0, 0)),
        ],
        out_specs=(org_block, stats_block),
        scratch_shapes=[pltpu.VMEM((K * Hs, out_w), jnp.float32)],
        compiler_params=pltpu.CompilerParams(
            dimension_semantics=("parallel", "arbitrary"),
            vmem_limit_bytes=_vmem_limit(p1_blocks, [(K * Hs, out_w)])),
    )(A, BmT, s2)

    # TODO(synk): for v7x deployments with B==1, also split this "parallel" work
    #             across TensorCores via an extra parallel spatial axis.
    p2_blocks = [(1, 2, 128), (1, K, TH, out_w), (1, K, TH, out_w)]
    scores = pl.pallas_call(
        functools.partial(_normalize_kernel,
                          inv_n=1.0 / float(K * out_h * out_w)),
        out_shape=jax.ShapeDtypeStruct((B, K, out_h, out_w), jnp.float32),
        grid=(B, HT),
        in_specs=[stats_block, org_block],
        out_specs=org_block,
        compiler_params=pltpu.CompilerParams(
            dimension_semantics=("parallel", "parallel"),
            vmem_limit_bytes=_vmem_limit(p2_blocks)),
    )(stats, score_org)

    return score_org, scores


def _interp_matrix(out_size, in_size):
    """Row-stochastic matrix realizing 1-D bilinear interp, align_corners=True."""
    if in_size == 1:
        return jnp.ones((out_size, 1), jnp.float32)
    pos = jnp.arange(out_size, dtype=jnp.float32) * (in_size - 1) / (out_size - 1)
    lo = jnp.clip(jnp.floor(pos).astype(jnp.int32), 0, in_size - 2)
    frac = pos - lo.astype(jnp.float32)
    rows = jnp.arange(out_size)
    m = jnp.zeros((out_size, in_size), jnp.float32)
    m = m.at[rows, lo].add(1.0 - frac)
    m = m.at[rows, lo + 1].add(frac)
    return m


# ----------------------------------------------------------------------------
# MPNet forward (configuration: mp layer disabled, score scaling enabled).
# ----------------------------------------------------------------------------
@functools.partial(jax.jit, static_argnames=("output_stride", "tile_h"))
def mpnet_forward(inputs, w_head, b_head, output_stride=4, tile_h=None):
    B, C, H, W = inputs.shape
    Hs, Ws = H // output_stride, W // output_stride

    # --- DeepLab stand-in: avg-pool (XLA glue, stand-in for the external backbone)
    #     + Pallas 1x1-conv classification head ---
    feat = inputs.reshape(B, C, Hs, output_stride, Ws, output_stride).mean(axis=(3, 5))
    scores_small = conv1x1_head(w_head, b_head, feat)        # (B, K, Hs, Ws)

    scores_small_out = scores_small      # scores_small  (mp layer disabled)
    scores_small_mp = scores_small       # scores_small_mp

    # F.interpolate(..., bilinear, align_corners=True) to the input size, then
    # LayerNorm over (C,H,W) with eps=0, no affine (enable_score_scale=True).
    score_org, scores = upsample_and_layernorm(scores_small, H, W, tile_h=tile_h)

    edge_map = None
    label_context = None
    edge_weight_dirs = None
    return (score_org, scores, edge_map, label_context,
            scores_small_out, scores_small_mp, edge_weight_dirs)


# ----------------------------------------------------------------------------
# Pure-JAX reference (same math, no Pallas) for a sanity check.
# ----------------------------------------------------------------------------
def _reference(inputs, w_head, b_head, output_stride=4):
    B, C, H, W = inputs.shape
    Hs, Ws = H // output_stride, W // output_stride
    feat = inputs.reshape(B, C, Hs, output_stride, Ws, output_stride).mean(axis=(3, 5))
    scores_small = jnp.einsum("kc,bchw->bkhw", w_head, feat) + b_head[None, :, None, None]
    A = _interp_matrix(H, Hs)
    Bm = _interp_matrix(W, Ws)
    up = jnp.einsum("hH,bkHW,wW->bkhw", A, scores_small, Bm)
    mean = up.mean(axis=(1, 2, 3), keepdims=True)
    var = ((up - mean) ** 2).mean(axis=(1, 2, 3), keepdims=True)
    scores = (up - mean) / jnp.sqrt(var)
    return up, scores, scores_small


if __name__ == "__main__":
    key = jax.random.PRNGKey(0)
    k_x, k_w, k_b = jax.random.split(key, 3)

    B, C, H, W = 2, 4, 16, 16
    n_classes = 8

    x = jax.random.normal(k_x, (B, C, H, W), dtype=jnp.float32)
    w_head = jax.random.normal(k_w, (n_classes, C), dtype=jnp.float32) * 0.1
    b_head = jax.random.normal(k_b, (n_classes,), dtype=jnp.float32) * 0.1

    # tile_h=8 exercises the multi-H-tile stats-accumulation path (HT=2).
    outs = mpnet_forward(x, w_head, b_head, output_stride=4, tile_h=8)
    outs = jax.block_until_ready(outs)
    score_org, scores, edge_map, label_context, scores_small, scores_small_mp, ew = outs

    # sanity check against pure-JAX reference
    ref_org, ref_scores, ref_small = _reference(x, w_head, b_head, output_stride=4)
    assert jnp.allclose(score_org, ref_org, rtol=1e-4, atol=1e-4)
    assert jnp.allclose(scores, ref_scores, rtol=1e-4, atol=1e-4)
    assert jnp.allclose(scores_small, ref_small, rtol=1e-4, atol=1e-4)
    assert score_org.shape == (B, n_classes, H, W)
    assert scores.shape == (B, n_classes, H, W)
    assert scores_small.shape == (B, n_classes, H // 4, W // 4)

    print("KERNEL_OK")
</pallas_src>

<mosaic_0001>
module attributes {stable_mosaic.version = 11 : i64} {
  func.func private @main(%arg0: i32) attributes {dimension_semantics = [#tpu.dimension_semantics<core_parallel>], iteration_bounds = array<i64: 2>, tpu.core_type = #tpu.core_type<sc_scalar_subcore>, window_params = []} {
    return
  }
}

module attributes {stable_mosaic.version = 11 : i64} {
  func.func private @main(%arg0: i32) attributes {dimension_semantics = [#tpu.dimension_semantics<core_parallel>], iteration_bounds = array<i64: 2>, tpu.core_type = #tpu.core_type<sc_scalar_subcore>, window_params = []} {
    return
  }
}

module attributes {stable_mosaic.version = 11 : i64} {
  func.func @_head_kernel(%arg0: i32, %arg1: i32, %arg2: memref<8x4xf32, #tpu.memory_space<vmem>>, %arg3: memref<8x1xf32, #tpu.memory_space<vmem>>, %arg4: memref<1x4x16xf32, #tpu.memory_space<vmem>>, %arg5: memref<1x8x16xf32, #tpu.memory_space<vmem>>) attributes {dimension_semantics = [#tpu.dimension_semantics<parallel>, #tpu.dimension_semantics<parallel>], iteration_bounds = array<i64: 2, 1>, scalar_prefetch = 0 : i64, scratch_operands = 0 : i64, tpu.core_type = #tpu.core_type<tc>, window_params = [{pipeline_mode = #tpu.pipeline_mode<synchronous>, transform_indices = @transform_0, window_bounds = array<i64: 8, 4>}, {pipeline_mode = #tpu.pipeline_mode<synchronous>, transform_indices = @transform_1, window_bounds = array<i64: 8, 1>}, {transform_indices = @transform_2, window_bounds = array<i64: 1, 4, 16>}, {transform_indices = @transform_3, window_bounds = array<i64: 1, 8, 16>}]} {
    %c0 = arith.constant 0 : index
    %c0_0 = arith.constant 0 : index
    %0 = vector.load %arg2[%c0, %c0_0] : memref<8x4xf32, #tpu.memory_space<vmem>>, vector<8x4xf32>
    %c0_1 = arith.constant 0 : index
    %c0_2 = arith.constant 0 : index
    %c0_3 = arith.constant 0 : index
    %1 = vector.load %arg4[%c0_1, %c0_2, %c0_3] : memref<1x4x16xf32, #tpu.memory_space<vmem>>, vector<1x4x16xf32>
    %2 = vector.shape_cast %1 : vector<1x4x16xf32> to vector<4x16xf32>
    %cst = arith.constant dense<0.000000e+00> : vector<8x16xf32>
    %3 = tpu.matmul %0, %2, %cst {dimension_numbers = #tpu.dot_dimension_numbers<[1], [0], [0], [1], [0, 0, 1, 1], [], []>} : vector<8x4xf32>, vector<4x16xf32>, vector<8x16xf32> -> vector<8x16xf32>
    %c0_4 = arith.constant 0 : index
    %c0_5 = arith.constant 0 : index
    %4 = vector.load %arg3[%c0_4, %c0_5] : memref<8x1xf32, #tpu.memory_space<vmem>>, vector<8x1xf32>
    %5 = vector.broadcast %4 : vector<8x1xf32> to vector<8x16xf32>
    %6 = arith.addf %3, %5 : vector<8x16xf32>
    %c0_6 = arith.constant 0 : index
    %c0_7 = arith.constant 0 : index
    %c0_8 = arith.constant 0 : index
    %7 = vector.load %arg5[%c0_6, %c0_7, %c0_8] : memref<1x8x16xf32, #tpu.memory_space<vmem>>, vector<1x8x16xf32>
    %8 = vector.shape_cast %7 : vector<1x8x16xf32> to vector<8x16xf32>
    %9 = vector.shape_cast %6 : vector<8x16xf32> to vector<1x8x16xf32>
    tpu.vector_store %arg5[%c0_6, %c0_7, %c0_8], %9 {strides = array<i32>} : memref<1x8x16xf32, #tpu.memory_space<vmem>>, vector<1x8x16xf32>,
    return
  }
  func.func @transform_0(%arg0: i32, %arg1: i32) -> (i32, i32) {
    %c0_i32 = arith.constant 0 : i32
    %c0_i32_0 = arith.constant 0 : i32
    %c0_i32_1 = arith.constant 0 : i32
    return %c0_i32, %c0_i32_0 : i32, i32
  }
  func.func @transform_1(%arg0: i32, %arg1: i32) -> (i32, i32) {
    %c0_i32 = arith.constant 0 : i32
    %c0_i32_0 = arith.constant 0 : i32
    %c0_i32_1 = arith.constant 0 : i32
    return %c0_i32, %c0_i32_0 : i32, i32
  }
  func.func @transform_2(%arg0: i32, %arg1: i32) -> (i32, i32, i32) {
    %c0_i32 = arith.constant 0 : i32
    %c0_i32_0 = arith.constant 0 : i32
    return %arg0, %c0_i32, %arg1 : i32, i32, i32
  }
  func.func @transform_3(%arg0: i32, %arg1: i32) -> (i32, i32, i32) {
    %c0_i32 = arith.constant 0 : i32
    %c0_i32_0 = arith.constant 0 : i32
    return %arg0, %c0_i32, %arg1 : i32, i32, i32
  }
}

module attributes {stable_mosaic.version = 11 : i64} {
  func.func @_normalize_kernel(%arg0: i32, %arg1: i32, %arg2: memref<1x2x128xf32, #tpu.memory_space<vmem>>, %arg3: memref<1x8x8x16xf32, #tpu.memory_space<vmem>>, %arg4: memref<1x8x8x16xf32, #tpu.memory_space<vmem>>) attributes {dimension_semantics = [#tpu.dimension_semantics<parallel>, #tpu.dimension_semantics<parallel>], iteration_bounds = array<i64: 2, 2>, scalar_prefetch = 0 : i64, scratch_operands = 0 : i64, tpu.core_type = #tpu.core_type<tc>, window_params = [{transform_indices = @transform_0, window_bounds = array<i64: 1, 2, 128>}, {transform_indices = @transform_1, window_bounds = array<i64: 1, 8, 8, 16>}, {transform_indices = @transform_2, window_bounds = array<i64: 1, 8, 8, 16>}]} {
    %c0 = arith.constant 0 : index
    %c0_0 = arith.constant 0 : index
    %c0_1 = arith.constant 0 : index
    %0 = vector.load %arg2[%c0, %c0_0, %c0_1] : memref<1x2x128xf32, #tpu.memory_space<vmem>>, vector<1x1x1xf32>
    %1 = vector.extract %0[0, 0, 0] : f32 from vector<1x1x1xf32>
    %c0_2 = arith.constant 0 : index
    %c1 = arith.constant 1 : index
    %c0_3 = arith.constant 0 : index
    %2 = vector.load %arg2[%c0_2, %c1, %c0_3] : memref<1x2x128xf32, #tpu.memory_space<vmem>>, vector<1x1x1xf32>
    %3 = vector.extract %2[0, 0, 0] : f32 from vector<1x1x1xf32>
    %cst = arith.constant 4.8828125E-4 : f32
    %4 = arith.mulf %1, %cst : f32
    %cst_4 = arith.constant 4.8828125E-4 : f32
    %5 = arith.mulf %3, %cst_4 : f32
    %6 = arith.mulf %4, %4 : f32
    %7 = arith.subf %5, %6 : f32
    %c0_5 = arith.constant 0 : index
    %c0_6 = arith.constant 0 : index
    %c0_7 = arith.constant 0 : index
    %c0_8 = arith.constant 0 : index
    %8 = vector.load %arg3[%c0_5, %c0_6, %c0_7, %c0_8] : memref<1x8x8x16xf32, #tpu.memory_space<vmem>>, vector<1x8x8x16xf32>
    %9 = vector.shape_cast %8 : vector<1x8x8x16xf32> to vector<8x8x16xf32>
    %10 = vector.broadcast %4 : f32 to vector<8x8x16xf32>
    %11 = arith.subf %9, %10 : vector<8x8x16xf32>
    %12 = math.rsqrt %7 : f32
    %13 = vector.broadcast %12 : f32 to vector<8x8x16xf32>
    %14 = arith.mulf %11, %13 : vector<8x8x16xf32>
    %c0_9 = arith.constant 0 : index
    %c0_10 = arith.constant 0 : index
    %c0_11 = arith.constant 0 : index
    %c0_12 = arith.constant 0 : index
    %15 = vector.load %arg4[%c0_9, %c0_10, %c0_11, %c0_12] : memref<1x8x8x16xf32, #tpu.memory_space<vmem>>, vector<1x8x8x16xf32>
    %16 = vector.shape_cast %15 : vector<1x8x8x16xf32> to vector<8x8x16xf32>
    %17 = vector.shape_cast %14 : vector<8x8x16xf32> to vector<1x8x8x16xf32>
    tpu.vector_store %arg4[%c0_9, %c0_10, %c0_11, %c0_12], %17 {strides = array<i32>} : memref<1x8x8x16xf32, #tpu.memory_space<vmem>>, vector<1x8x8x16xf32>,
    return
  }
  func.func @transform_0(%arg0: i32, %arg1: i32) -> (i32, i32, i32) {
    %c0_i32 = arith.constant 0 : i32
    %c0_i32_0 = arith.constant 0 : i32
    %c0_i32_1 = arith.constant 0 : i32
    return %arg0, %c0_i32, %c0_i32_0 : i32, i32, i32
  }
  func.func @transform_1(%arg0: i32, %arg1: i32) -> (i32, i32, i32, i32) {
    %c0_i32 = arith.constant 0 : i32
    %c0_i32_0 = arith.constant 0 : i32
    %c0_i32_1 = arith.constant 0 : i32
    return %arg0, %c0_i32, %arg1, %c0_i32_0 : i32, i32, i32, i32
  }
  func.func @transform_2(%arg0: i32, %arg1: i32) -> (i32, i32, i32, i32) {
    %c0_i32 = arith.constant 0 : i32
    %c0_i32_0 = arith.constant 0 : i32
    %c0_i32_1 = arith.constant 0 : i32
    return %arg0, %c0_i32, %arg1, %c0_i32_0 : i32, i32, i32, i32
  }
}

module attributes {stable_mosaic.version = 11 : i64} {
  func.func @_upsample_stats_kernel(%arg0: i32, %arg1: i32, %arg2: memref<8x4xf32, #tpu.memory_space<vmem>>, %arg3: memref<4x16xf32, #tpu.memory_space<vmem>>, %arg4: memref<1x32x4xf32, #tpu.memory_space<vmem>>, %arg5: memref<1x8x8x16xf32, #tpu.memory_space<vmem>>, %arg6: memref<1x2x128xf32, #tpu.memory_space<vmem>>, %arg7: memref<32x16xf32, #tpu.memory_space<vmem>>) attributes {dimension_semantics = [#tpu.dimension_semantics<parallel>, #tpu.dimension_semantics<arbitrary>], iteration_bounds = array<i64: 2, 2>, scalar_prefetch = 0 : i64, scratch_operands = 1 : i64, tpu.core_type = #tpu.core_type<tc>, window_params = [{transform_indices = @transform_0, window_bounds = array<i64: 8, 4>}, {pipeline_mode = #tpu.pipeline_mode<synchronous>, transform_indices = @transform_1, window_bounds = array<i64: 4, 16>}, {transform_indices = @transform_2, window_bounds = array<i64: 1, 32, 4>}, {transform_indices = @transform_3, window_bounds = array<i64: 1, 8, 8, 16>}, {transform_indices = @transform_4, window_bounds = array<i64: 1, 2, 128>}]} {
    %c0_i32 = arith.constant 0 : i32
    %0 = arith.cmpi eq, %arg1, %c0_i32 : i32
    %1 = arith.extui %0 : i1 to i32
    %c0_i32_0 = arith.constant 0 : i32
    %2 = arith.cmpi ne, %1, %c0_i32_0 : i32
    scf.if %2 {
      %c0_74 = arith.constant 0 : index
      %c0_75 = arith.constant 0 : index
      %c0_76 = arith.constant 0 : index
      %146 = vector.load %arg4[%c0_74, %c0_75, %c0_76] : memref<1x32x4xf32, #tpu.memory_space<vmem>>, vector<1x32x4xf32>
      %147 = vector.shape_cast %146 : vector<1x32x4xf32> to vector<32x4xf32>
      %c0_77 = arith.constant 0 : index
      %c0_78 = arith.constant 0 : index
      %148 = vector.load %arg3[%c0_77, %c0_78] : memref<4x16xf32, #tpu.memory_space<vmem>>, vector<4x16xf32>
      %cst_79 = arith.constant dense<0.000000e+00> : vector<32x16xf32>
      %149 = tpu.matmul %147, %148, %cst_79 {dimension_numbers = #tpu.dot_dimension_numbers<[1], [0], [0], [1], [0, 0, 1, 1], [], []>} : vector<32x4xf32>, vector<4x16xf32>, vector<32x16xf32> -> vector<32x16xf32>
      %c0_80 = arith.constant 0 : index
      %c0_81 = arith.constant 0 : index
      %150 = vector.load %arg7[%c0_80, %c0_81] : memref<32x16xf32, #tpu.memory_space<vmem>>, vector<32x16xf32>
      tpu.vector_store %arg7[%c0_80, %c0_81], %149 {strides = array<i32>} : memref<32x16xf32, #tpu.memory_space<vmem>>, vector<32x16xf32>,
      %cst_82 = arith.constant 0.000000e+00 : f32
      %151 = vector.broadcast %cst_82 : f32 to vector<1x2x128xf32>
      %c0_83 = arith.constant 0 : index
      %c0_84 = arith.constant 0 : index
      %c0_85 = arith.constant 0 : index
      %152 = vector.load %arg6[%c0_83, %c0_84, %c0_85] : memref<1x2x128xf32, #tpu.memory_space<vmem>>, vector<1x2x128xf32>
      tpu.vector_store %arg6[%c0_83, %c0_84, %c0_85], %151 {strides = array<i32>} : memref<1x2x128xf32, #tpu.memory_space<vmem>>, vector<1x2x128xf32>,
    } else {
    }
    %c0 = arith.constant 0 : index
    %c0_1 = arith.constant 0 : index
    %3 = vector.load %arg2[%c0, %c0_1] : memref<8x4xf32, #tpu.memory_space<vmem>>, vector<8x4xf32>
    %c0_2 = arith.constant 0 : index
    %c0_3 = arith.constant 0 : index
    %4 = vector.load %arg7[%c0_2, %c0_3] : memref<32x16xf32, #tpu.memory_space<vmem>>, vector<4x16xf32>
    %cst = arith.constant dense<0.000000e+00> : vector<8x16xf32>
    %5 = tpu.matmul %3, %4, %cst {dimension_numbers = #tpu.dot_dimension_numbers<[1], [0], [0], [1], [0, 0, 1, 1], [], []>} : vector<8x4xf32>, vector<4x16xf32>, vector<8x16xf32> -> vector<8x16xf32>
    %c0_4 = arith.constant 0 : index
    %c0_5 = arith.constant 0 : index
    %c0_6 = arith.constant 0 : index
    %c0_7 = arith.constant 0 : index
    %6 = vector.load %arg5[%c0_4, %c0_5, %c0_6, %c0_7] : memref<1x8x8x16xf32, #tpu.memory_space<vmem>>, vector<1x1x8x16xf32>
    %7 = vector.shape_cast %6 : vector<1x1x8x16xf32> to vector<8x16xf32>
    %8 = vector.shape_cast %5 : vector<8x16xf32> to vector<1x1x8x16xf32>
    tpu.vector_store %arg5[%c0_4, %c0_5, %c0_6, %c0_7], %8 {strides = array<i32>} : memref<1x8x8x16xf32, #tpu.memory_space<vmem>>, vector<1x1x8x16xf32>,
    %9 = vector.shape_cast %5 : vector<8x16xf32> to vector<1x8x16xf32>
    %cst_8 = arith.constant dense<0.000000e+00> : vector<1xf32>
    %10 = vector.multi_reduction <add>, %9, %cst_8 [1, 2] : vector<1x8x16xf32> to vector<1xf32>
    %11 = vector.shape_cast %10 : vector<1xf32> to vector<1x1x1xf32>
    %12 = vector.extract %11[0, 0, 0] : f32 from vector<1x1x1xf32>
    %cst_9 = arith.constant 0.000000e+00 : f32
    %13 = arith.addf %cst_9, %12 : f32
    %14 = arith.mulf %5, %5 : vector<8x16xf32>
    %15 = vector.shape_cast %14 : vector<8x16xf32> to vector<1x8x16xf32>
    %cst_10 = arith.constant dense<0.000000e+00> : vector<1xf32>
    %16 = vector.multi_reduction <add>, %15, %cst_10 [1, 2] : vector<1x8x16xf32> to vector<1xf32>
    %17 = vector.shape_cast %16 : vector<1xf32> to vector<1x1x1xf32>
    %18 = vector.extract %17[0, 0, 0] : f32 from vector<1x1x1xf32>
    %cst_11 = arith.constant 0.000000e+00 : f32
    %19 = arith.addf %cst_11, %18 : f32
    %c4 = arith.constant 4 : index
    %c0_12 = arith.constant 0 : index
    %20 = vector.load %arg7[%c4, %c0_12] : memref<32x16xf32, #tpu.memory_space<vmem>>, vector<4x16xf32>
    %cst_13 = arith.constant dense<0.000000e+00> : vector<8x16xf32>
    %21 = tpu.matmul %3, %20, %cst_13 {dimension_numbers = #tpu.dot_dimension_numbers<[1], [0], [0], [1], [0, 0, 1, 1], [], []>} : vector<8x4xf32>, vector<4x16xf32>, vector<8x16xf32> -> vector<8x16xf32>
    %c0_14 = arith.constant 0 : index
    %c1 = arith.constant 1 : index
    %c0_15 = arith.constant 0 : index
    %c0_16 = arith.constant 0 : index
    %22 = vector.load %arg5[%c0_14, %c1, %c0_15, %c0_16] : memref<1x8x8x16xf32, #tpu.memory_space<vmem>>, vector<1x1x8x16xf32>
    %23 = vector.shape_cast %22 : vector<1x1x8x16xf32> to vector<8x16xf32>
    %24 = vector.shape_cast %21 : vector<8x16xf32> to vector<1x1x8x16xf32>
    tpu.vector_store %arg5[%c0_14, %c1, %c0_15, %c0_16], %24 {strides = array<i32>} : memref<1x8x8x16xf32, #tpu.memory_space<vmem>>, vector<1x1x8x16xf32>,
    %25 = vector.shape_cast %21 : vector<8x16xf32> to vector<1x8x16xf32>
    %cst_17 = arith.constant dense<0.000000e+00> : vector<1xf32>
    %26 = vector.multi_reduction <add>, %25, %cst_17 [1, 2] : vector<1x8x16xf32> to vector<1xf32>
    %27 = vector.shape_cast %26 : vector<1xf32> to vector<1x1x1xf32>
    %28 = vector.extract %27[0, 0, 0] : f32 from vector<1x1x1xf32>
    %29 = arith.addf %13, %28 : f32
    %30 = arith.mulf %21, %21 : vector<8x16xf32>
    %31 = vector.shape_cast %30 : vector<8x16xf32> to vector<1x8x16xf32>
    %cst_18 = arith.constant dense<0.000000e+00> : vector<1xf32>
    %32 = vector.multi_reduction <add>, %31, %cst_18 [1, 2] : vector<1x8x16xf32> to vector<1xf32>
    %33 = vector.shape_cast %32 : vector<1xf32> to vector<1x1x1xf32>
    %34 = vector.extract %33[0, 0, 0] : f32 from vector<1x1x1xf32>
    %35 = arith.addf %19, %34 : f32
    %c8 = arith.constant 8 : index
    %c0_19 = arith.constant 0 : index
    %36 = vector.load %arg7[%c8, %c0_19] : memref<32x16xf32, #tpu.memory_space<vmem>>, vector<4x16xf32>
    %cst_20 = arith.constant dense<0.000000e+00> : vector<8x16xf32>
    %37 = tpu.matmul %3, %36, %cst_20 {dimension_numbers = #tpu.dot_dimension_numbers<[1], [0], [0], [1], [0, 0, 1, 1], [], []>} : vector<8x4xf32>, vector<4x16xf32>, vector<8x16xf32> -> vector<8x16xf32>
    %c0_21 = arith.constant 0 : index
    %c2 = arith.constant 2 : index
    %c0_22 = arith.constant 0 : index
    %c0_23 = arith.constant 0 : index
    %38 = vector.load %arg5[%c0_21, %c2, %c0_22, %c0_23] : memref<1x8x8x16xf32, #tpu.memory_space<vmem>>, vector<1x1x8x16xf32>
    %39 = vector.shape_cast %38 : vector<1x1x8x16xf32> to vector<8x16xf32>
    %40 = vector.shape_cast %37 : vector<8x16xf32> to vector<1x1x8x16xf32>
    tpu.vector_store %arg5[%c0_21, %c2, %c0_22, %c0_23], %40 {strides = array<i32>} : memref<1x8x8x16xf32, #tpu.memory_space<vmem>>, vector<1x1x8x16xf32>,
    %41 = vector.shape_cast %37 : vector<8x16xf32> to vector<1x8x16xf32>
    %cst_24 = arith.constant dense<0.000000e+00> : vector<1xf32>
    %42 = vector.multi_reduction <add>, %41, %cst_24 [1, 2] : vector<1x8x16xf32> to vector<1xf32>
    %43 = vector.shape_cast %42 : vector<1xf32> to vector<1x1x1xf32>
    %44 = vector.extract %43[0, 0, 0] : f32 from vector<1x1x1xf32>
    %45 = arith.addf %29, %44 : f32
    %46 = arith.mulf %37, %37 : vector<8x16xf32>
    %47 = vector.shape_cast %46 : vector<8x16xf32> to vector<1x8x16xf32>
    %cst_25 = arith.constant dense<0.000000e+00> : vector<1xf32>
    %48 = vector.multi_reduction <add>, %47, %cst_25 [1, 2] : vector<1x8x16xf32> to vector<1xf32>
    %49 = vector.shape_cast %48 : vector<1xf32> to vector<1x1x1xf32>
    %50 = vector.extract %49[0, 0, 0] : f32 from vector<1x1x1xf32>
    %51 = arith.addf %35, %50 : f32
    %c12 = arith.constant 12 : index
    %c0_26 = arith.constant 0 : index
    %52 = vector.load %arg7[%c12, %c0_26] : memref<32x16xf32, #tpu.memory_space<vmem>>, vector<4x16xf32>
    %cst_27 = arith.constant dense<0.000000e+00> : vector<8x16xf32>
    %53 = tpu.matmul %3, %52, %cst_27 {dimension_numbers = #tpu.dot_dimension_numbers<[1], [0], [0], [1], [0, 0, 1, 1], [], []>} : vector<8x4xf32>, vector<4x16xf32>, vector<8x16xf32> -> vector<8x16xf32>
    %c0_28 = arith.constant 0 : index
    %c3 = arith.constant 3 : index
    %c0_29 = arith.constant 0 : index
    %c0_30 = arith.constant 0 : index
    %54 = vector.load %arg5[%c0_28, %c3, %c0_29, %c0_30] : memref<1x8x8x16xf32, #tpu.memory_space<vmem>>, vector<1x1x8x16xf32>
    %55 = vector.shape_cast %54 : vector<1x1x8x16xf32> to vector<8x16xf32>
    %56 = vector.shape_cast %53 : vector<8x16xf32> to vector<1x1x8x16xf32>
    tpu.vector_store %arg5[%c0_28, %c3, %c0_29, %c0_30], %56 {strides = array<i32>} : memref<1x8x8x16xf32, #tpu.memory_space<vmem>>, vector<1x1x8x16xf32>,
    %57 = vector.shape_cast %53 : vector<8x16xf32> to vector<1x8x16xf32>
    %cst_31 = arith.constant dense<0.000000e+00> : vector<1xf32>
    %58 = vector.multi_reduction <add>, %57, %cst_31 [1, 2] : vector<1x8x16xf32> to vector<1xf32>
    %59 = vector.shape_cast %58 : vector<1xf32> to vector<1x1x1xf32>
    %60 = vector.extract %59[0, 0, 0] : f32 from vector<1x1x1xf32>
    %61 = arith.addf %45, %60 : f32
    %62 = arith.mulf %53, %53 : vector<8x16xf32>
    %63 = vector.shape_cast %62 : vector<8x16xf32> to vector<1x8x16xf32>
    %cst_32 = arith.constant dense<0.000000e+00> : vector<1xf32>
    %64 = vector.multi_reduction <add>, %63, %cst_32 [1, 2] : vector<1x8x16xf32> to vector<1xf32>
    %65 = vector.shape_cast %64 : vector<1xf32> to vector<1x1x1xf32>
    %66 = vector.extract %65[0, 0, 0] : f32 from vector<1x1x1xf32>
    %67 = arith.addf %51, %66 : f32
    %c16 = arith.constant 16 : index
    %c0_33 = arith.constant 0 : index
    %68 = vector.load %arg7[%c16, %c0_33] : memref<32x16xf32, #tpu.memory_space<vmem>>, vector<4x16xf32>
    %cst_34 = arith.constant dense<0.000000e+00> : vector<8x16xf32>
    %69 = tpu.matmul %3, %68, %cst_34 {dimension_numbers = #tpu.dot_dimension_numbers<[1], [0], [0], [1], [0, 0, 1, 1], [], []>} : vector<8x4xf32>, vector<4x16xf32>, vector<8x16xf32> -> vector<8x16xf32>
    %c0_35 = arith.constant 0 : index
    %c4_36 = arith.constant 4 : index
    %c0_37 = arith.constant 0 : index
    %c0_38 = arith.constant 0 : index
    %70 = vector.load %arg5[%c0_35, %c4_36, %c0_37, %c0_38] : memref<1x8x8x16xf32, #tpu.memory_space<vmem>>, vector<1x1x8x16xf32>
    %71 = vector.shape_cast %70 : vector<1x1x8x16xf32> to vector<8x16xf32>
    %72 = vector.shape_cast %69 : vector<8x16xf32> to vector<1x1x8x16xf32>
    tpu.vector_store %arg5[%c0_35, %c4_36, %c0_37, %c0_38], %72 {strides = array<i32>} : memref<1x8x8x16xf32, #tpu.memory_space<vmem>>, vector<1x1x8x16xf32>,
    %73 = vector.shape_cast %69 : vector<8x16xf32> to vector<1x8x16xf32>
    %cst_39 = arith.constant dense<0.000000e+00> : vector<1xf32>
    %74 = vector.multi_reduction <add>, %73, %cst_39 [1, 2] : vector<1x8x16xf32> to vector<1xf32>
    %75 = vector.shape_cast %74 : vector<1xf32> to vector<1x1x1xf32>
    %76 = vector.extract %75[0, 0, 0] : f32 from vector<1x1x1xf32>
    %77 = arith.addf %61, %76 : f32
    %78 = arith.mulf %69, %69 : vector<8x16xf32>
    %79 = vector.shape_cast %78 : vector<8x16xf32> to vector<1x8x16xf32>
    %cst_40 = arith.constant dense<0.000000e+00> : vector<1xf32>
    %80 = vector.multi_reduction <add>, %79, %cst_40 [1, 2] : vector<1x8x16xf32> to vector<1xf32>
    %81 = vector.shape_cast %80 : vector<1xf32> to vector<1x1x1xf32>
    %82 = vector.extract %81[0, 0, 0] : f32 from vector<1x1x1xf32>
    %83 = arith.addf %67, %82 : f32
    %c20 = arith.constant 20 : index
    %c0_41 = arith.constant 0 : index
    %84 = vector.load %arg7[%c20, %c0_41] : memref<32x16xf32, #tpu.memory_space<vmem>>, vector<4x16xf32>
    %cst_42 = arith.constant dense<0.000000e+00> : vector<8x16xf32>
    %85 = tpu.matmul %3, %84, %cst_42 {dimension_numbers = #tpu.dot_dimension_numbers<[1], [0], [0], [1], [0, 0, 1, 1], [], []>} : vector<8x4xf32>, vector<4x16xf32>, vector<8x16xf32> -> vector<8x16xf32>
    %c0_43 = arith.constant 0 : index
    %c5 = arith.constant 5 : index
    %c0_44 = arith.constant 0 : index
    %c0_45 = arith.constant 0 : index
    %86 = vector.load %arg5[%c0_43, %c5, %c0_44, %c0_45] : memref<1x8x8x16xf32, #tpu.memory_space<vmem>>, vector<1x1x8x16xf32>
    %87 = vector.shape_cast %86 : vector<1x1x8x16xf32> to vector<8x16xf32>
    %88 = vector.shape_cast %85 : vector<8x16xf32> to vector<1x1x8x16xf32>
    tpu.vector_store %arg5[%c0_43, %c5, %c0_44, %c0_45], %88 {strides = array<i32>} : memref<1x8x8x16xf32, #tpu.memory_space<vmem>>, vector<1x1x8x16xf32>,
    %89 = vector.shape_cast %85 : vector<8x16xf32> to vector<1x8x16xf32>
    %cst_46 = arith.constant dense<0.000000e+00> : vector<1xf32>
    %90 = vector.multi_reduction <add>, %89, %cst_46 [1, 2] : vector<1x8x16xf32> to vector<1xf32>
    %91 = vector.shape_cast %90 : vector<1xf32> to vector<1x1x1xf32>
    %92 = vector.extract %91[0, 0, 0] : f32 from vector<1x1x1xf32>
    %93 = arith.addf %77, %92 : f32
    %94 = arith.mulf %85, %85 : vector<8x16xf32>
    %95 = vector.shape_cast %94 : vector<8x16xf32> to vector<1x8x16xf32>
    %cst_47 = arith.constant dense<0.000000e+00> : vector<1xf32>
    %96 = vector.multi_reduction <add>, %95, %cst_47 [1, 2] : vector<1x8x16xf32> to vector<1xf32>
    %97 = vector.shape_cast %96 : vector<1xf32> to vector<1x1x1xf32>
    %98 = vector.extract %97[0, 0, 0] : f32 from vector<1x1x1xf32>
    %99 = arith.addf %83, %98 : f32
    %c24 = arith.constant 24 : index
    %c0_48 = arith.constant 0 : index
    %100 = vector.load %arg7[%c24, %c0_48] : memref<32x16xf32, #tpu.memory_space<vmem>>, vector<4x16xf32>
    %cst_49 = arith.constant dense<0.000000e+00> : vector<8x16xf32>
    %101 = tpu.matmul %3, %100, %cst_49 {dimension_numbers = #tpu.dot_dimension_numbers<[1], [0], [0], [1], [0, 0, 1, 1], [], []>} : vector<8x4xf32>, vector<4x16xf32>, vector<8x16xf32> -> vector<8x16xf32>
    %c0_50 = arith.constant 0 : index
    %c6 = arith.constant 6 : index
    %c0_51 = arith.constant 0 : index
    %c0_52 = arith.constant 0 : index
    %102 = vector.load %arg5[%c0_50, %c6, %c0_51, %c0_52] : memref<1x8x8x16xf32, #tpu.memory_space<vmem>>, vector<1x1x8x16xf32>
    %103 = vector.shape_cast %102 : vector<1x1x8x16xf32> to vector<8x16xf32>
    %104 = vector.shape_cast %101 : vector<8x16xf32> to vector<1x1x8x16xf32>
    tpu.vector_store %arg5[%c0_50, %c6, %c0_51, %c0_52], %104 {strides = array<i32>} : memref<1x8x8x16xf32, #tpu.memory_space<vmem>>, vector<1x1x8x16xf32>,
    %105 = vector.shape_cast %101 : vector<8x16xf32> to vector<1x8x16xf32>
    %cst_53 = arith.constant dense<0.000000e+00> : vector<1xf32>
    %106 = vector.multi_reduction <add>, %105, %cst_53 [1, 2] : vector<1x8x16xf32> to vector<1xf32>
    %107 = vector.shape_cast %106 : vector<1xf32> to vector<1x1x1xf32>
    %108 = vector.extract %107[0, 0, 0] : f32 from vector<1x1x1xf32>
    %109 = arith.addf %93, %108 : f32
    %110 = arith.mulf %101, %101 : vector<8x16xf32>
    %111 = vector.shape_cast %110 : vector<8x16xf32> to vector<1x8x16xf32>
    %cst_54 = arith.constant dense<0.000000e+00> : vector<1xf32>
    %112 = vector.multi_reduction <add>, %111, %cst_54 [1, 2] : vector<1x8x16xf32> to vector<1xf32>
    %113 = vector.shape_cast %112 : vector<1xf32> to vector<1x1x1xf32>
    %114 = vector.extract %113[0, 0, 0] : f32 from vector<1x1x1xf32>
    %115 = arith.addf %99, %114 : f32
    %c28 = arith.constant 28 : index
    %c0_55 = arith.constant 0 : index
    %116 = vector.load %arg7[%c28, %c0_55] : memref<32x16xf32, #tpu.memory_space<vmem>>, vector<4x16xf32>
    %cst_56 = arith.constant dense<0.000000e+00> : vector<8x16xf32>
    %117 = tpu.matmul %3, %116, %cst_56 {dimension_numbers = #tpu.dot_dimension_numbers<[1], [0], [0], [1], [0, 0, 1, 1], [], []>} : vector<8x4xf32>, vector<4x16xf32>, vector<8x16xf32> -> vector<8x16xf32>
    %c0_57 = arith.constant 0 : index
    %c7 = arith.constant 7 : index
    %c0_58 = arith.constant 0 : index
    %c0_59 = arith.constant 0 : index
    %118 = vector.load %arg5[%c0_57, %c7, %c0_58, %c0_59] : memref<1x8x8x16xf32, #tpu.memory_space<vmem>>, vector<1x1x8x16xf32>
    %119 = vector.shape_cast %118 : vector<1x1x8x16xf32> to vector<8x16xf32>
    %120 = vector.shape_cast %117 : vector<8x16xf32> to vector<1x1x8x16xf32>
    tpu.vector_store %arg5[%c0_57, %c7, %c0_58, %c0_59], %120 {strides = array<i32>} : memref<1x8x8x16xf32, #tpu.memory_space<vmem>>, vector<1x1x8x16xf32>,
    %121 = vector.shape_cast %117 : vector<8x16xf32> to vector<1x8x16xf32>
    %cst_60 = arith.constant dense<0.000000e+00> : vector<1xf32>
    %122 = vector.multi_reduction <add>, %121, %cst_60 [1, 2] : vector<1x8x16xf32> to vector<1xf32>
    %123 = vector.shape_cast %122 : vector<1xf32> to vector<1x1x1xf32>
    %124 = vector.extract %123[0, 0, 0] : f32 from vector<1x1x1xf32>
    %125 = arith.addf %109, %124 : f32
    %126 = arith.mulf %117, %117 : vector<8x16xf32>
    %127 = vector.shape_cast %126 : vector<8x16xf32> to vector<1x8x16xf32>
    %cst_61 = arith.constant dense<0.000000e+00> : vector<1xf32>
    %128 = vector.multi_reduction <add>, %127, %cst_61 [1, 2] : vector<1x8x16xf32> to vector<1xf32>
    %129 = vector.shape_cast %128 : vector<1xf32> to vector<1x1x1xf32>
    %130 = vector.extract %129[0, 0, 0] : f32 from vector<1x1x1xf32>
    %131 = arith.addf %115, %130 : f32
    %c0_62 = arith.constant 0 : index
    %c0_63 = arith.constant 0 : index
    %c0_64 = arith.constant 0 : index
    %132 = vector.load %arg6[%c0_62, %c0_63, %c0_64] : memref<1x2x128xf32, #tpu.memory_space<vmem>>, vector<1x1x128xf32>
    %133 = vector.shape_cast %132 : vector<1x1x128xf32> to vector<1x128xf32>
    %134 = vector.broadcast %125 : f32 to vector<1x128xf32>
    %135 = arith.addf %133, %134 : vector<1x128xf32>
    %c0_65 = arith.constant 0 : index
    %c0_66 = arith.constant 0 : index
    %c0_67 = arith.constant 0 : index
    %136 = vector.load %arg6[%c0_65, %c0_66, %c0_67] : memref<1x2x128xf32, #tpu.memory_space<vmem>>, vector<1x1x128xf32>
    %137 = vector.shape_cast %136 : vector<1x1x128xf32> to vector<1x128xf32>
    %138 = vector.shape_cast %135 : vector<1x128xf32> to vector<1x1x128xf32>
    tpu.vector_store %arg6[%c0_65, %c0_66, %c0_67], %138 {strides = array<i32>} : memref<1x2x128xf32, #tpu.memory_space<vmem>>, vector<1x1x128xf32>,
    %c0_68 = arith.constant 0 : index
    %c1_69 = arith.constant 1 : index
    %c0_70 = arith.constant 0 : index
    %139 = vector.load %arg6[%c0_68, %c1_69, %c0_70] : memref<1x2x128xf32, #tpu.memory_space<vmem>>, vector<1x1x128xf32>
    %140 = vector.shape_cast %139 : vector<1x1x128xf32> to vector<1x128xf32>
    %141 = vector.broadcast %131 : f32 to vector<1x128xf32>
    %142 = arith.addf %140, %141 : vector<1x128xf32>
    %c0_71 = arith.constant 0 : index
    %c1_72 = arith.constant 1 : index
    %c0_73 = arith.constant 0 : index
    %143 = vector.load %arg6[%c0_71, %c1_72, %c0_73] : memref<1x2x128xf32, #tpu.memory_space<vmem>>, vector<1x1x128xf32>
    %144 = vector.shape_cast %143 : vector<1x1x128xf32> to vector<1x128xf32>
    %145 = vector.shape_cast %142 : vector<1x128xf32> to vector<1x1x128xf32>
    tpu.vector_store %arg6[%c0_71, %c1_72, %c0_73], %145 {strides = array<i32>} : memref<1x2x128xf32, #tpu.memory_space<vmem>>, vector<1x1x128xf32>,
    return
  }
  func.func @transform_0(%arg0: i32, %arg1: i32) -> (i32, i32) {
    %c0_i32 = arith.constant 0 : i32
    %c0_i32_0 = arith.constant 0 : i32
    return %arg1, %c0_i32 : i32, i32
  }
  func.func @transform_1(%arg0: i32, %arg1: i32) -> (i32, i32) {
    %c0_i32 = arith.constant 0 : i32
    %c0_i32_0 = arith.constant 0 : i32
    %c0_i32_1 = arith.constant 0 : i32
    return %c0_i32, %c0_i32_0 : i32, i32
  }
  func.func @transform_2(%arg0: i32, %arg1: i32) -> (i32, i32, i32) {
    %c0_i32 = arith.constant 0 : i32
    %c0_i32_0 = arith.constant 0 : i32
    %c0_i32_1 = arith.constant 0 : i32
    return %arg0, %c0_i32, %c0_i32_0 : i32, i32, i32
  }
  func.func @transform_3(%arg0: i32, %arg1: i32) -> (i32, i32, i32, i32) {
    %c0_i32 = arith.constant 0 : i32
    %c0_i32_0 = arith.constant 0 : i32
    %c0_i32_1 = arith.constant 0 : i32
    return %arg0, %c0_i32, %arg1, %c0_i32_0 : i32, i32, i32, i32
  }
  func.func @transform_4(%arg0: i32, %arg1: i32) -> (i32, i32, i32) {
    %c0_i32 = arith.constant 0 : i32
    %c0_i32_0 = arith.constant 0 : i32
    %c0_i32_1 = arith.constant 0 : i32
    return %arg0, %c0_i32, %c0_i32_0 : i32, i32, i32
  }
}

</mosaic_0001>

<bundles_post_ra>
// kernel: mpnet_forward.3
= control target key start
LH: loop header
LB: loop body
LE: loop exit
PB: predicated region body
PF: predicated region fallthrough
CT: control target
= control target key end

     0   :  { %s452_s12 = smov 0   ;;  %s454_s13 = smov 0   ;;  %s491_s0 = inlined_call_operand.vmem [shape: f32[8,4], index: 0, kind: input, shape index: {}]   ;;  %s492_s1 = inlined_call_operand.vmem [shape: f32[8,1], index: 1, kind: input, shape index: {}]   ;;  %s493_s2 = inlined_call_operand.vmem [shape: f32[2,4,16], index: 2, kind: input, shape index: {}]   ;;  %s494_s3 = inlined_call_operand.vmem [shape: f32[2,8,16], index: 3, kind: output, shape index: {}]  }
   0x1   :  { %s456_s14 = smov 0  }
   0x2 LB: > { %s25_s15 = sadd.s32 1, %s423_s13  ;;  %p363_p0 = scmp.ge.s32.totalorder %s427_s14, 1  ;;  %s427_s14 = sphi %s456_s14, %s13_s14   ;;  %s423_s13 = sphi %s454_s13, %s496_s13   ;;  %s419_s12 = sphi %s452_s12, %s495_s12  }
   0x3   : > { %p27_p1 = scmp.ge.s32.totalorder %s25_s15, 2  ;;  %p155_p2 = scmp.lt.s32.totalorder %s427_s14, 3 }
   0x5   : > { %s498_s15 = smov (%p27_p1, %s25_s15), 0  ;;  %p156_p3 = pnand %p363_p0, %p155_p2 }
   0x6   : > { %p183_p4 = scmp.lt.s32.totalorder (!%p156_p3), %s419_s12, 1  ;;  %v429_v0 = vmov (!%p156_p3), 0.0   ;;  %vm430_vm0 = vmmov (!%p156_p3), 0   ;;  %v199_v1 = vld [vmem:[%s492_s1] sm:$0xff] (!%p156_p3)  ;;  %v431_v2 = vmov (!%p156_p3), 0   ;;  %vm209_vm1 = vcmask (!%p156_p3), 1043456  }
   0x7   : > { %159 = sbr.rel (%p156_p3) target bundleno = 234 (0xea), region = 32  ;;  %372 = vmatprep.subr.mxu0 (!%p156_p3), %v429_v0  ;;  %374 = vmatprep.mubr.msk.f32.mxu0 (!%p156_p3), %vm430_vm0, %v429_v0  ;;  %v197_v3 = vld [vmem:[%s491_s0] sm:$0xff] (!%p156_p3)  ;;  %vm205_vm2 = vcmask (!%p156_p3), 31744   ;;  %vm283_vm3 = vcmask (!%p156_p3), 130048  }
   0x8   : > { %404 = vset.pattern.permute.xlu0 (!%p156_p3), %v431_v2 }
   0x9   : > { %202 = vperm.xlu0 (!%p156_p3), %404, %v199_v1  }
   0xe   : > { %s500_s12 = smov (!%p183_p4, %s419_s12), 1 }
   0xf   : > { %s364_s18 = sshll.u32 %s500_s12, 2  ;;  %s365_s24 = sshll.u32 %s500_s12, 3 }
  0x10   : > { %s189_s21 = scalar_lea.vmem %s493_s2, %s364_s18  ;;  %s196_s27 = scalar_lea.vmem %s494_s3, %s365_s24 }
  0x11   : > { %v198_v4 = vld [vmem:[%s189_s21] sm:$0xf] }
  0x12   : > { %373 = vmatpush3.msk.msra.mxu0 %vm209_vm1, %v198_v4 }
  0x13   : > { %375 = vmatmul.mubr.msk.f32.vlgmr.msra.gmra.mrb[0].mxu0 %vm205_vm2, %v197_v3 }
  0x88   : > { %v203_v5 = vpop.permute.xlu0 %202 }
  0xe6   : > { %v279_v6 = vpop.f32.mrb[0].mxu0 }
  0xe7   : > { %v280_v7 = vadd.f32 %v279_v6, %v203_v5  ;;  %v376_v8 = vpop.f32.mrb[1].mxu0 }
  0xe9   : > { %284 = vst.msk [vmem:[%s196_s27] sm:$0xff] %vm283_vm3, %v280_v7 }
  0xea PF: > { %s13_s14 = sadd.s32 1, %s427_s14   ;;  %s495_s12 = smov %s423_s13 }
  0xeb   : > { %p10_p5 = scmp.ge.s32.totalorder %s13_s14, 4   ;;  %s496_s13 = smov %s498_s15 }
  0xed   :  { %12 = sbr.rel (!%p10_p5) target bundleno = 2 (0x2), region = 62 }

// kernel: mpnet_forward.5
= control target key start
LH: loop header
LB: loop body
LE: loop exit
PB: predicated region body
PF: predicated region fallthrough
CT: control target
= control target key end

     0   :  { %7 = vsyncpa [#allocation4], 0  ;;  %s772_s0 = inlined_call_operand.vmem [shape: f32[2,2,128], index: 0, kind: input, shape index: {}]   ;;  %s773_s1 = inlined_call_operand.vmem [shape: f32[2,8,16,16], index: 1, kind: input, shape index: {}]   ;;  %s774_s2 = inlined_call_operand.hbm [shape: f32[2,8,16,16], index: 2, kind: output, shape index: {}]  }
   0x1   :  { %9 = vsyncpa [#allocation4 + $0x1], 0  ;;  %s608_s9 = smov 0   ;;  %s610_s10 = smov 0  }
   0x2   :  { %s612_s11 = smov 0   ;;  %s614_s12 = smov 0  }
   0x3   :  { %s616_s13 = smov 0   ;;  %s618_s14 = smov 0  }
   0x4   :  { %s620_s15 = smov 0   ;;  %s622_s16 = smov 0  }
   0x5 LB: > { %s395_s17 = sadd.s32 4294967295, %s587_s16   ;;  %s396_s18 = sadd.s32 4294967294, %s587_s16   ;;  %s587_s16 = sphi %s622_s16, %s15_s16   ;;  %s583_s15 = sphi %s620_s15, %s784_s15   ;;  %s579_s14 = sphi %s618_s14, %s783_s14   ;;  %s575_s13 = sphi %s616_s13, %s782_s13   ;;  %s571_s12 = sphi %s614_s12, %s781_s12   ;;  %s567_s11 = sphi %s612_s11, %s780_s11   ;;  %s563_s10 = sphi %s610_s10, %s779_s10   ;;  %s559_s9 = sphi %s608_s9, %s778_s9  }
   0x6   : > { %s24_s19 = sadd.s32 1, %s579_s14  ;;  %s27_s20 = sadd.s32 1, %s583_s15 }
   0x7   : > { %p25_p0 = scmp.ge.s32.totalorder %s24_s19, 2  ;;  %p69_p1 = scmp.ne.s32.totalorder %s567_s11, %s563_s10 }
   0x8   : > { %p70_p2 = scmp.eq.s32.totalorder %s587_s16, 0  ;;  %p101_p5 = scmp.eq.s32.totalorder %s395_s17, 3 }
   0x9   : > { %s786_s19 = smov (%p25_p0, %s24_s19), 0  ;;  %s788_s20 = smov (!%p25_p0, %s27_s20), %s583_s15 }
   0xa   : > { %s58_s21 = ssub.s32 %s579_s14, %s786_s19  ;;  %p660_p3 = por %p70_p2, %p69_p1 }
   0xb   : > { %p29_p4 = scmp.ge.s32.totalorder %s788_s20, 2  ;;  %p106_p6 = scmp.ne.s32.totalorder %s563_s10, %s559_s9 }
   0xc   : > { %p107_p7 = scmp.eq.s32.totalorder %s396_s18, 3  ;;  %p668_p8 = por %p101_p5, %p69_p1 }
   0xd   : > { %s790_s20 = smov (%p29_p4, %s788_s20), 0  ;;  %s62_s27 = sadd.s32 1, %s567_s11 }
   0xe   : > { %p672_p9 = por %p107_p7, %p106_p6  ;;  %s57_s25 = ssub.s32 %s583_s15, %s790_s20 }
   0xf   : > { %s59_s26 = sor.u32 %s58_s21, %s57_s25  ;;  %p398_p11 = scmp.ge.s32.totalorder %s587_s16, 4 }
  0x10   : > { %p60_p10 = scmp.eq.s32.totalorder %s59_s26, 0 }
  0x11   : > { %123 = sbr.rel (%p398_p11) target bundleno = 34 (0x22), region = 16 }
  0x12   : > { %s680_s28 = scalar_select %p60_p10, %s567_s11, %s62_s27  }
  0x18   : > { %133 = sbr.rel (!%p660_p3) target bundleno = 34 (0x22), region = 24  ;;  %s135_s29 = sand.u32 (%p660_p3), 1, %s567_s11  }
  0x19   : > { %s400_s30 = sshll.u32 (%p660_p3), %s583_s15, 4  ;;  %s399_s3 = sshll.u32 (%p660_p3), %s135_s29, 6 }
  0x1a   : > { %s139_s4 = sadd.s32 (%p660_p3), %s579_s14, %s400_s30  ;;  %s137_s17 = scalar_lea.vmem (%p660_p3), [#allocation2], %s399_s3 }
  0x1b   : > { %s401_s5 = sshll.u32 (%p660_p3), %s139_s4, 3 }
  0x1c   : > { %s141_s8 = scalar_lea.vmem (%p660_p3), %s773_s1, %s401_s5 }
  0x1d   : > { %v183_v0 = vld [vmem:[%s141_s8] sm:$0xff] (%p660_p3)  ;;  %v185_v1 = vld [vmem:[%s141_s8 + $0x10] sm:$0xff] (%p660_p3) }
  0x1e   : > { %v187_v2 = vld [vmem:[%s141_s8 + $0x20] sm:$0xff] (%p660_p3)  ;;  %184 = vst [vmem:[%s137_s17] sm:$0xff] (%p660_p3), %v183_v0  ;;  %186 = vst [vmem:[%s137_s17 + $0x8] sm:$0xff] (%p660_p3), %v185_v1  ;;  %v189_v3 = vld [vmem:[%s141_s8 + $0x30] sm:$0xff] (%p660_p3) }
  0x1f   : > { %188 = vst [vmem:[%s137_s17 + $0x10] sm:$0xff] %v187_v2  ;;  %v191_v4 = vld [vmem:[%s141_s8 + $0x40] sm:$0xff]  ;;  %v193_v5 = vld [vmem:[%s141_s8 + $0x50] sm:$0xff]  ;;  %190 = vst [vmem:[%s137_s17 + $0x18] sm:$0xff] %v189_v3 }
  0x20   : > { %192 = vst [vmem:[%s137_s17 + $0x20] sm:$0xff] %v191_v4  ;;  %194 = vst [vmem:[%s137_s17 + $0x28] sm:$0xff] %v193_v5  ;;  %v195_v6 = vld [vmem:[%s141_s8 + $0x60] sm:$0xff]  ;;  %v197_v7 = vld [vmem:[%s141_s8 + $0x70] sm:$0xff] }
  0x21   : > { %196 = vst [vmem:[%s137_s17 + $0x30] sm:$0xff] %v195_v6  ;;  %198 = vst [vmem:[%s137_s17 + $0x38] sm:$0xff] %v197_v7 }
  0x22 PF: > { %p402_p12 = scmp.ge.s32.totalorder %s587_s16, 1  ;;  %p203_p13 = scmp.lt.s32.totalorder %s587_s16, 5 }
  0x24   : > { %p204_p0 = pnand %p402_p12, %p203_p13 }
  0x25   : > { %p235_p1 = scmp.lt.s32.totalorder (!%p204_p0), %s575_s13, 1  ;;  %s210_s6 = sand.u32 (!%p204_p0), 1, %s563_s10   ;;  %vm276_vm0 = vcmask (!%p204_p0), 130048  }
  0x26   : > { %207 = sbr.rel (%p204_p0) target bundleno = 190 (0xbe), region = 62  ;;  %s403_s7 = sshll.u32 (!%p204_p0), %s210_s6, 6 }
  0x27   : > { %s407_s8 = sshll.u32 (!%p204_p0), %s575_s13, 4  ;;  %s234_s22 = scalar_lea.vmem (!%p204_p0), [#allocation3], %s403_s7 }
  0x28   : > { %s297_s17 = sadd.s32 (!%p204_p0), %s571_s12, %s407_s8  ;;  %s300_s25 = sshll.u32 (!%p204_p0), %s234_s22, 4  ;;  %s708_s25 = int_to_ptr.vmem [resolvable:$true] %s300_s25 }
  0x2d   : > { %s236_s18 = scalar_select %p235_p1, %s575_s13, 1 }
  0x2f   : > { %s405_s21 = sshll.u32 %s236_s18, 1  ;;  %s212_s18 = scalar_lea.vmem [#allocation2], %s403_s7 }
  0x30   : > { %s238_s26 = scalar_lea.vmem %s772_s0, %s405_s21  ;;  %v247_v13 = vld [vmem:[%s212_s18] sm:$0xff]  ;;  %v248_v14 = vld [vmem:[%s212_s18 + $0x8] sm:$0xff]  ;;  %v249_v15 = vld [vmem:[%s212_s18 + $0x10] sm:$0xff]  ;;  %s408_s21 = sshll.u32 %s297_s17, 7 }
  0x31   : > { %v239_v8 = vld [vmem:[%s238_s26] sm:$0x1]  ;;  %v241_v9 = vld [vmem:[%s238_s26 + $0x1] sm:$0x1]  ;;  %v250_v16 = vld [vmem:[%s212_s18 + $0x18] sm:$0xff] }
  0x32   : > { %411 = vpush %v239_v8  ;;  %v251_v17 = vld [vmem:[%s212_s18 + $0x20] sm:$0xff]  ;;  %v252_v18 = vld [vmem:[%s212_s18 + $0x28] sm:$0xff]  ;;  %v253_v19 = vld [vmem:[%s212_s18 + $0x30] sm:$0xff] }
  0x33   : > { %413 = vpush %v241_v9  ;;  %v254_v20 = vld [vmem:[%s212_s18 + $0x38] sm:$0xff] }
  0x63   : > { %s412_s27 = spop %411 }
  0x64   : > { %s243_s29 = smul.f32 0.00048828125, %s412_s27  ;;  %s414_s30 = spop %413 }
  0x65   : > { %s244_s3 = smul.f32 0.00048828125, %s414_s30  ;;  %s706_s27 = scalar_lea.hbm %s774_s2, %s408_s21 }
  0x66   : > { %s245_s4 = smul.f32 %s243_s29, %s243_s29  ;;  %v255_v12 = vstv %s243_s29  ;;  %s720_s29 = scalar_lea.sflag [#allocation4], %s210_s6 }
  0x67   : > { %v256_v21 = vsub.f32 %v247_v13, %v255_v12  ;;  %v257_v22 = vsub.f32 %v248_v14, %v255_v12  ;;  %v258_v23 = vsub.f32 %v249_v15, %v255_v12  ;;  %v259_v24 = vsub.f32 %v250_v16, %v255_v12  ;;  %s493_s30 = scalar_lea.vmem %s708_s25, 1024 }
  0x68   : > { %s246_s5 = ssub.f32 %s244_s3, %s245_s4  ;;  %v260_v25 = vsub.f32 %v251_v17, %v255_v12  ;;  %v261_v26 = vsub.f32 %v252_v18, %v255_v12  ;;  %v262_v27 = vsub.f32 %v253_v19, %v255_v12  ;;  %v263_v28 = vsub.f32 %v254_v20, %v255_v12  ;;  %p494_p2 = scmp.ne.s32.totalorder %s708_s25, %s493_s30 }
  0x69   : > { %s589_s3 = smov [#allocation3]  }
  0x6a   : > { %v264_v10 = vstv %s246_s5  ;;  %p495_p3 = pnand %p494_p2, %p668_p8  ;;  %s497_s4 = sshll.u32 %s589_s3, 4  ;;  %s498_s4 = int_to_ptr.vmem [resolvable:$false] %s497_s4 }
  0x6b   : > { %491 = vrsqrt.f32 %v264_v10  ;;  %s499_s5 = scalar_lea.vmem %s498_s4, 2048  ;;  %p500_p5 = scmp.lt.s32.totalorder %s708_s25, %s498_s4 }
  0x6c   : > { %p496_p4 = pneg %p495_p3  ;;  %p501_p6 = scmp.lt.s32.totalorder %s499_s5, %s493_s30 }
  0x6e   : > { %p502_p7 = por %p501_p6, %p500_p5 }
  0x70   : > { %p503_p10 = pnand %p502_p7, %p496_p4 }
  0x75   : > { %v492_v11 = vpop.eup %491 }
  0x76   : > { %415 = vpush %v492_v11 }
  0xa7   : > { %s416_s12 = spop %415 }
  0xa8   : > { %v267_v29 = vstv %s416_s12 }
  0xa9   : > { %v268_v30 = vmul.f32 %v267_v29, %v256_v21  ;;  %v269_v31 = vmul.f32 %v267_v29, %v257_v22  ;;  %v270_v32 = vmul.f32 %v267_v29, %v258_v23  ;;  %v271_v33 = vmul.f32 %v267_v29, %v259_v24 }
  0xaa   : > { %v272_v34 = vmul.f32 %v267_v29, %v260_v25  ;;  %v273_v35 = vmul.f32 %v267_v29, %v261_v26  ;;  %v274_v36 = vmul.f32 %v267_v29, %v262_v27  ;;  %v275_v37 = vmul.f32 %v267_v29, %v263_v28 }
  0xab   : > { %277 = vst.msk [vmem:[%s234_s22] sm:$0xff] %vm276_vm0, %v268_v30  ;;  %278 = vst.msk [vmem:[%s234_s22 + $0x8] sm:$0xff] %vm276_vm0, %v269_v31 }
  0xac   : > { %279 = vst.msk [vmem:[%s234_s22 + $0x10] sm:$0xff] %vm276_vm0, %v270_v32  ;;  %280 = vst.msk [vmem:[%s234_s22 + $0x18] sm:$0xff] %vm276_vm0, %v271_v33 }
  0xad   : > { %281 = vst.msk [vmem:[%s234_s22 + $0x20] sm:$0xff] %vm276_vm0, %v272_v34  ;;  %282 = vst.msk [vmem:[%s234_s22 + $0x28] sm:$0xff] %vm276_vm0, %v273_v35 }
  0xae   : > { %283 = vst.msk [vmem:[%s234_s22 + $0x30] sm:$0xff] %vm276_vm0, %v274_v36  ;;  %284 = vst.msk [vmem:[%s234_s22 + $0x38] sm:$0xff] %vm276_vm0, %v275_v37 }
  0xaf   : > { %506 = shalt.err (!%p503_p10)
}
  0xb0   : > { %s507_s6 = scalar_lea.hbm %s706_s27, 1024  ;;  %s511_s17 = scalar_lea.hbm %s774_s2, 4096 }
  0xb1   : > { %p508_p11 = scmp.ne.s32.totalorder %s706_s27, %s507_s6  ;;  %p512_p0 = scmp.lt.u32.totalorder %s706_s27, %s774_s2 }
  0xb2   : > { %p513_p1 = scmp.lt.u32.totalorder %s511_s17, %s507_s6  ;;  %p515_p3 = scmp.lt.u32.totalorder %s507_s6, %s706_s27 }
  0xb3   : > { %p509_p12 = pnand %p508_p11, %p668_p8 }
  0xb4   : > { %p514_p2 = por %p513_p1, %p512_p0 }
  0xb5   : > { %p510_p13 = pneg %p509_p12 }
  0xb6   : > { %p516_p4 = por %p515_p3, %p514_p2 }
  0xb8   : > { %p517_p5 = pnand %p516_p4, %p510_p13 }
  0xba   : > { %520 = shalt.err (!%p517_p5)
}
  0xbb   : > { %s590_s22 = smov 128   ;;  %s591_s12 = smov 256  }
  0xbc   : > { %s592_s13 = smov 8  }
  0xbd   : > { %417 = dma.vmem_to_hbm [thread:$0]  (%p668_p8), %s708_s25, 1024, %s706_s27, %s720_s29, %s590_s22, %s591_s12, %s592_s13  }
  0xbe PF: > { %p423_p6 = scmp.ge.s32.totalorder %s587_s16, 2  ;;  %s315_s26 = sand.u32 1, %s559_s9  }
  0xbf   : > { %s316_s30 = scalar_lea.sflag [#allocation4], %s315_s26 }
  0xc0   : > { %p420_p7 = pnand %p423_p6, %p672_p9 }
  0xc2   : > { %554 = dma.done.wait (!%p420_p7), %s316_s30, 1024  }
  0xc3   : > { %556 = vsyncadd (!%p420_p7), %s316_s30, 4294966272  ;;  %s15_s16 = sadd.s32 1, %s587_s16   ;;  %s778_s9 = smov %s563_s10 }
  0xc4   : > { %p12_p10 = scmp.ge.s32.totalorder %s15_s16, 6   ;;  %s779_s10 = smov %s567_s11 }
  0xc5   : > { %s780_s11 = smov %s680_s28  ;;  %s781_s12 = smov %s579_s14 }
  0xc6   : > { %s782_s13 = smov %s583_s15  ;;  %s783_s14 = smov %s786_s19 }
  0xc7   : > { %s784_s15 = smov %s790_s20  ;;  %14 = sbr.rel (!%p12_p10) target bundleno = 5 (0x5), region = 109 }
  0xce   :  { %321 = vsyncpa [#allocation4], 1 }
  0xcf   :  { %323 = vsyncpa [#allocation4 + $0x1], 1 }

// kernel: mpnet_forward.4
= control target key start
LH: loop header
LB: loop body
LE: loop exit
PB: predicated region body
PF: predicated region fallthrough
CT: control target
= control target key end

     0   :  { %s1807_s0 = inlined_call_operand.vmem [shape: f32[16,4], index: 0, kind: input, shape index: {}]   ;;  %s1808_s1 = inlined_call_operand.vmem [shape: f32[4,16], index: 1, kind: input, shape index: {}]   ;;  %s1809_s2 = inlined_call_operand.vmem [shape: f32[2,32,4], index: 2, kind: input, shape index: {}]   ;;  %s1810_s3 = inlined_call_operand.vmem [shape: f32[2,8,16,16], index: 3, kind: output, shape index: {0}]   ;;  %s1811_s4 = inlined_call_operand.vmem [shape: f32[2,2,128], index: 4, kind: output, shape index: {1}]  }
   0x1   :  { %1816 = sst [smem:[#allocation9_spill]] %s1807_s0 }
   0x2   :  { %1817 = sst [smem:[#allocation10_spill]] %s1808_s1 }
   0x3   :  { %1818 = sst [smem:[#allocation11_spill]] %s1809_s2 }
   0x4   :  { %1819 = sst [smem:[#allocation12_spill]] %s1811_s4 }
   0x5   :  { %s1626_s15 = smov 0   ;;  %s1628_s16 = smov 0  }
   0x6   :  { %s1630_s17 = smov 0   ;;  %s1632_s18 = smov 0  }
   0x7   :  { %s1634_s19 = smov 0   ;;  %s1636_s20 = smov 0  }
   0x8   :  { %s1638_s21 = smov 0  }
   0x9 LB: > { %1820 = sst [smem:[#allocation4_spill]] %s1588_s19  ;;  %s24_s22 = sadd.s32 1, %s1588_s19  ;;  %s1596_s21 = sphi %s1638_s21, %s15_s21   ;;  %s1592_s20 = sphi %s1636_s20, %s1834_s20   ;;  %s1588_s19 = sphi %s1634_s19, %s1833_s19   ;;  %s1584_s18 = sphi %s1632_s18, %s1838_s18   ;;  %s1580_s17 = sphi %s1630_s17, %s1837_s17   ;;  %s1576_s16 = sphi %s1628_s16, %s1836_s16   ;;  %s1572_s15 = sphi %s1626_s15, %s1835_s15  }
   0xa   : > { %1821 = sst [smem:[#allocation5_spill]] %s1592_s20  ;;  %p25_p0 = scmp.ge.s32.totalorder %s24_s22, 2 }
   0xb   : > { %s27_s23 = sadd.s32 1, %s1592_s20  ;;  %s1335_s24 = sadd.s32 4294967295, %s1596_s21  }
   0xc   : > { %p119_p1 = scmp.ne.s32.totalorder %s1576_s16, %s1572_s15  ;;  %s1840_s22 = smov (%p25_p0, %s24_s22), 0 }
   0xd   : > { %1822 = sst [smem:[#allocation6_spill]] %s1840_s22  ;;  %s1842_s23 = smov (!%p25_p0, %s27_s23), %s1592_s20 }
   0xe   : > { %s105_s25 = ssub.s32 %s1588_s19, %s1840_s22  ;;  %p120_p2 = scmp.eq.s32.totalorder %s1335_s24, 3 }
   0xf   : > { %p29_p3 = scmp.ge.s32.totalorder %s1842_s23, 2  ;;  %p1339_p4 = scmp.ge.s32.totalorder %s1596_s21, 1 }
  0x10   : > { %p1672_p5 = por %p120_p2, %p119_p1  ;;  %p188_p6 = scmp.lt.s32.totalorder %s1596_s21, 5 }
  0x11   : > { %s1844_s23 = smov (%p29_p3, %s1842_s23), 0  ;;  %s109_s29 = sadd.s32 1, %s1576_s16 }
  0x12   : > { %1824 = sst [smem:[#allocation7_spill]] %s1844_s23  ;;  %p189_p7 = pnand %p1339_p4, %p188_p6 }
  0x13   : > { %s104_s27 = ssub.s32 %s1592_s20, %s1844_s23  ;;  %s212_s5 = sand.u32 (!%p189_p7), 1, %s1572_s15  }
  0x14   : > { %s106_s28 = sor.u32 %s105_s25, %s104_s27  ;;  %192 = sbr.rel (%p189_p7) target bundleno = 716 (0x2cc), region = 32 }
  0x15   : > { %p107_p8 = scmp.eq.s32.totalorder %s106_s28, 0  ;;  %p221_p9 = scmp.lt.s32.totalorder (!%p189_p7), %s1580_s17, 1 }
  0x16   : > { %s1340_s6 = sshll.u32 (!%p189_p7), %s212_s5, 6  ;;  %p225_p10 = scmp.lt.s32.totalorder (!%p189_p7), %s1584_s18, 1 }
  0x17   : > { %s1683_s30 = scalar_select %p107_p8, %s1576_s16, %s109_s29  }
  0x18   : > { %s1826_s0 = sld [smem:[#allocation9_spill]] (!%p189_p7)  ;;  %s1827_s2 = sld [smem:[#allocation11_spill]] (!%p189_p7) }
  0x19   : > { %1825 = sst [smem:[#allocation8_spill]] %s1683_s30  ;;  %s1828_s4 = sld [smem:[#allocation12_spill]] (!%p189_p7) }
  0x1a   : > { %s1703_s5 = scalar_lea.vmem (!%p189_p7), [#allocation3], %s1340_s6  ;;  %p1345_p11 = scmp.ne.s32.totalorder (!%p189_p7), %s1580_s17, 0 }
  0x1b   : > { %s222_s7 = scalar_select %p221_p9, %s1580_s17, 1 }
  0x1c   : > { %s226_s8 = scalar_select %p225_p10, %s1584_s18, 1 }
  0x1d   : > { %s1341_s9 = sshll.u32 %s222_s7, 3  ;;  %237 = sbr.rel (%p1345_p11) target bundleno = 255 (0xff), region = 36  ;;  %vm256_vm0 = vcmask (!%p1345_p11), 1043456   ;;  %vm243_vm1 = vcmask (!%p1345_p11), 31744   ;;  %v1598_v5 = vmov (!%p1345_p11), 0.0   ;;  %vm345_vm2 = vcmask (!%p1345_p11), 130048  }
  0x1e   : > { %s1693_s12 = scalar_lea.vmem %s1826_s0, %s1341_s9  ;;  %s1379_s13 = sshll.u32 %s226_s8, 5 }
  0x1f   : > { %s229_s25 = scalar_lea.vmem %s1827_s2, %s1379_s13  ;;  %s1344_s27 = sshll.u32 %s226_s8, 1 }
  0x20   : > { %s1701_s15 = scalar_lea.vmem %s1828_s4, %s1344_s27  ;;  %s1829_s1 = sld [smem:[#allocation10_spill]] (!%p1345_p11)  ;;  %v238_v1 = vld [vmem:[%s229_s25] sm:$0xff] (!%p1345_p11)  ;;  %v240_v2 = vld [vmem:[%s229_s25 + $0x10] sm:$0xff] (!%p1345_p11)  ;;  %v239_v3 = vld [vmem:[%s229_s25 + $0x8] sm:$0xff] (!%p1345_p11) }
  0x21   : > { %v241_v4 = vld [vmem:[%s229_s25 + $0x18] sm:$0xff] (!%p1345_p11)  ;;  %1403 = vmatprep.mubr.msk.f32.mxu0 (!%p1345_p11), %vm243_vm1, %v238_v1  ;;  %1406 = vmatprep.mubr.msk.f32.mxu1 (!%p1345_p11), %vm243_vm1, %v240_v2  ;;  %350 = vst [vmem:[%s1701_s15] sm:$0x3] (!%p1345_p11), %v1598_v5 }
  0x26   : > { %v242_v0 = vld [vmem:[%s1829_s1] sm:$0xf] }
  0x27   : > { %1401 = vmatprep.subr.msk.mxu0 %vm256_vm0, %v242_v0  ;;  %1449 = vmatprep.subr.msk.mxu1 %vm256_vm0, %v242_v0 }
  0x28   : > { %1402 = vmatpush3.msk.msra.mxu0 %vm256_vm0, %v242_v0  ;;  %1450 = vmatpush3.msk.msra.mxu1 %vm256_vm0, %v242_v0 }
  0x29   : > { %1404 = vmatmul.mubr.msk.f32.vlgmr.msra.gmra.mrb[0].mxu0 %vm243_vm1, %v239_v3  ;;  %1407 = vmatmul.mubr.msk.f32.vlgmr.msra.gmra.mrb[0].mxu1 %vm243_vm1, %v241_v4 }
  0xfc   : > { %v1405_v6 = vpop.f32.mrb[0].mxu0  ;;  %v1408_v7 = vpop.f32.mrb[0].mxu1 }
  0xfd   : > { %347 = vst.msk [vmem:[#allocation2 + $0x8] sm:$0xff] %vm345_vm2, %v1405_v6  ;;  %349 = vst.msk [vmem:[#allocation2 + $0x18] sm:$0xff] %vm345_vm2, %v1408_v7  ;;  %v326_v8 = vpop.f32.mrb[1].mxu0  ;;  %v336_v9 = vpop.f32.mrb[1].mxu1 }
  0xfe   : > { %346 = vst.msk [vmem:[#allocation2] sm:$0xff] %vm345_vm2, %v326_v8  ;;  %348 = vst.msk [vmem:[#allocation2 + $0x10] sm:$0xff] %vm345_vm2, %v336_v9 }
  0xff PF: > { %vm357_vm3 = vcmask 1043456   ;;  %v1599_v11 = vmov 0.0   ;;  %v351_v13 = vld [vmem:[%s1693_s12] sm:$0xff]  ;;  %vm353_vm4 = vcmask 31744   ;;  %vm1600_vm5 = vmmov 0  }
 0x100   : > { %1409 = vmatprep.subr.mxu0 %v1599_v11  ;;  %1414 = vmatprep.subr.mxu1 %v1599_v11  ;;  %vm431_vm6 = vcmask 130048  }
 0x101   : > { %1411 = vmatprep.mubr.msk.f32.mxu0 %vm1600_vm5, %v1599_v11  ;;  %1416 = vmatprep.mubr.msk.f32.mxu1 %vm1600_vm5, %v1599_v11 }
 0x104   : > { %v555_v14 = vld [vmem:[#allocation2 + $0x8] sm:$0xf]  ;;  %v654_v15 = vld [vmem:[#allocation2 + $0xc] sm:$0xf]  ;;  %v951_v18 = vld [vmem:[#allocation2 + $0x18] sm:$0xf] }
 0x105   : > { %v352_v10 = vld [vmem:[#allocation2] sm:$0xf]  ;;  %v456_v12 = vld [vmem:[#allocation2 + $0x4] sm:$0xf]  ;;  %v753_v16 = vld [vmem:[#allocation2 + $0x10] sm:$0xf] }
 0x106   : > { %1410 = vmatpush3.msk.msra.mxu0 %vm357_vm3, %v352_v10  ;;  %1415 = vmatpush3.msk.msra.mxu1 %vm357_vm3, %v456_v12  ;;  %v852_v17 = vld [vmem:[#allocation2 + $0x14] sm:$0xf]  ;;  %v1050_v19 = vld [vmem:[#allocation2 + $0x1c] sm:$0xf] }
 0x107   : > { %1412 = vmatmul.mubr.msk.f32.vlgmr.msra.gmra.mrb[0].mxu0 %vm353_vm4, %v351_v13  ;;  %1417 = vmatmul.mubr.msk.f32.vlgmr.msra.gmra.mrb[0].mxu1 %vm353_vm4, %v351_v13 }
 0x108   : > { %1419 = vmatprep.subr.mxu0 %v1599_v11  ;;  %1421 = vmatprep.mubr.msk.f32.mxu0 %vm1600_vm5, %v1599_v11 }
 0x109   : > { %1420 = vmatpush3.msk.msra.mxu0 %vm357_vm3, %v555_v14  ;;  %1424 = vmatprep.subr.mxu1 %v1599_v11 }
 0x10a   : > { %1425 = vmatpush3.msk.msra.mxu1 %vm357_vm3, %v654_v15  ;;  %1426 = vmatprep.mubr.msk.f32.mxu1 %vm1600_vm5, %v1599_v11 }
 0x10b   : > { %1422 = vmatmul.mubr.msk.f32.vlgmr.msra.gmra.mrb[2].mxu0 %vm353_vm4, %v351_v13  ;;  %1427 = vmatmul.mubr.msk.f32.vlgmr.msra.gmra.mrb[2].mxu1 %vm353_vm4, %v351_v13 }
 0x10c   : > { %1429 = vmatprep.subr.mxu0 %v1599_v11  ;;  %1431 = vmatprep.mubr.msk.f32.mxu0 %vm1600_vm5, %v1599_v11 }
 0x10d   : > { %1430 = vmatpush3.msk.msra.mxu0 %vm357_vm3, %v753_v16  ;;  %1434 = vmatprep.subr.mxu1 %v1599_v11 }
 0x10e   : > { %1435 = vmatpush3.msk.msra.mxu1 %vm357_vm3, %v852_v17  ;;  %1436 = vmatprep.mubr.msk.f32.mxu1 %vm1600_vm5, %v1599_v11 }
 0x10f   : > { %1432 = vmatmul.mubr.msk.f32.vlgmr.msra.gmra.mrb[4].mxu0 %vm353_vm4, %v351_v13  ;;  %1437 = vmatmul.mubr.msk.f32.vlgmr.msra.gmra.mrb[4].mxu1 %vm353_vm4, %v351_v13 }
 0x110   : > { %1439 = vmatprep.subr.mxu0 %v1599_v11  ;;  %1441 = vmatprep.mubr.msk.f32.mxu0 %vm1600_vm5, %v1599_v11 }
 0x111   : > { %1440 = vmatpush3.msk.msra.mxu0 %vm357_vm3, %v951_v18  ;;  %1444 = vmatprep.subr.mxu1 %v1599_v11 }
 0x112   : > { %1445 = vmatpush3.msk.msra.mxu1 %vm357_vm3, %v1050_v19  ;;  %1446 = vmatprep.mubr.msk.f32.mxu1 %vm1600_vm5, %v1599_v11 }
 0x113   : > { %1442 = vmatmul.mubr.msk.f32.vlgmr.msra.gmra.mrb[6].mxu0 %vm353_vm4, %v351_v13  ;;  %1447 = vmatmul.mubr.msk.f32.vlgmr.msra.gmra.mrb[6].mxu1 %vm353_vm4, %v351_v13 }
 0x1da   : > { %v427_v20 = vpop.f32.mrb[0].mxu0  ;;  %v526_v21 = vpop.f32.mrb[0].mxu1 }
 0x1db   : > { %432 = vst.msk [vmem:[%s1703_s5] sm:$0xff] %vm431_vm6, %v427_v20  ;;  %1355 = vst.msk [vmem:[%s1703_s5 + $0x8] sm:$0xff] %vm431_vm6, %v526_v21  ;;  %v1413_v22 = vpop.f32.mrb[1].mxu0  ;;  %v1418_v23 = vpop.f32.mrb[1].mxu1  ;;  %v532_v24 = vsel %vm431_vm6, %v526_v21, 0.0  ;;  %v433_v25 = vsel %vm431_vm6, %v427_v20, 0.0  ;;  %v543_v26 = vmul.f32 %v526_v21, %v526_v21  ;;  %v444_v27 = vmul.f32 %v427_v20, %v427_v20 }
 0x1dc   : > { %533 = vadd.xlane.f32.xlu1 %v532_v24  ;;  %434 = vadd.xlane.f32.xlu0 %v433_v25 }
 0x1dd   : > { %v544_v30 = vsel %vm431_vm6, %v543_v26, 0.0  ;;  %v445_v31 = vsel %vm431_vm6, %v444_v27, 0.0 }
 0x1de   : > { %v625_v28 = vpop.f32.mrb[2].mxu0  ;;  %v724_v29 = vpop.f32.mrb[2].mxu1 }
 0x1df   : > { %1358 = vst.msk [vmem:[%s1703_s5 + $0x10] sm:$0xff] %vm431_vm6, %v625_v28  ;;  %v1423_v32 = vpop.f32.mrb[3].mxu0  ;;  %1361 = vst.msk [vmem:[%s1703_s5 + $0x18] sm:$0xff] %vm431_vm6, %v724_v29  ;;  %v1428_v33 = vpop.f32.mrb[3].mxu1  ;;  %v642_v34 = vmul.f32 %v625_v28, %v625_v28  ;;  %v741_v36 = vmul.f32 %v724_v29, %v724_v29  ;;  %v631_v39 = vsel %vm431_vm6, %v625_v28, 0.0  ;;  %v730_v46 = vsel %vm431_vm6, %v724_v29, 0.0 }
 0x1e0   : > { %545 = vadd.xlane.f32.xlu1 %v544_v30  ;;  %446 = vadd.xlane.f32.xlu0 %v445_v31 }
 0x1e1   : > { %v643_v35 = vsel %vm431_vm6, %v642_v34, 0.0  ;;  %v742_v42 = vsel %vm431_vm6, %v741_v36, 0.0 }
 0x1e2   : > { %v823_v37 = vpop.f32.mrb[4].mxu0  ;;  %v922_v38 = vpop.f32.mrb[4].mxu1 }
 0x1e3   : > { %1364 = vst.msk [vmem:[%s1703_s5 + $0x20] sm:$0xff] %vm431_vm6, %v823_v37  ;;  %v1433_v40 = vpop.f32.mrb[5].mxu0  ;;  %1367 = vst.msk [vmem:[%s1703_s5 + $0x28] sm:$0xff] %vm431_vm6, %v922_v38  ;;  %v1438_v41 = vpop.f32.mrb[5].mxu1  ;;  %v840_v43 = vmul.f32 %v823_v37, %v823_v37  ;;  %v939_v50 = vmul.f32 %v922_v38, %v922_v38  ;;  %v829_v51 = vsel %vm431_vm6, %v823_v37, 0.0  ;;  %v928_v54 = vsel %vm431_vm6, %v922_v38, 0.0 }
 0x1e4   : > { %644 = vadd.xlane.f32.xlu1 %v643_v35  ;;  %632 = vadd.xlane.f32.xlu0 %v631_v39 }
 0x1e5   : > { %v841_v49 = vsel %vm431_vm6, %v840_v43, 0.0  ;;  %v940_v52 = vsel %vm431_vm6, %v939_v50, 0.0 }
 0x1e6   : > { %v1021_v44 = vpop.f32.mrb[6].mxu0  ;;  %v1120_v45 = vpop.f32.mrb[6].mxu1 }
 0x1e7   : > { %1370 = vst.msk [vmem:[%s1703_s5 + $0x30] sm:$0xff] %vm431_vm6, %v1021_v44  ;;  %v1443_v47 = vpop.f32.mrb[7].mxu0  ;;  %1373 = vst.msk [vmem:[%s1703_s5 + $0x38] sm:$0xff] %vm431_vm6, %v1120_v45  ;;  %v1448_v48 = vpop.f32.mrb[7].mxu1  ;;  %v1038_v53 = vmul.f32 %v1021_v44, %v1021_v44  ;;  %v1137_v56 = vmul.f32 %v1120_v45, %v1120_v45  ;;  %v1027_v57 = vsel %vm431_vm6, %v1021_v44, 0.0  ;;  %v1126_v59 = vsel %vm431_vm6, %v1120_v45, 0.0 }
 0x1e8   : > { %743 = vadd.xlane.f32.xlu1 %v742_v42  ;;  %731 = vadd.xlane.f32.xlu0 %v730_v46 }
 0x1e9   : > { %v1039_v55 = vsel %vm431_vm6, %v1038_v53, 0.0  ;;  %v1138_v58 = vsel %vm431_vm6, %v1137_v56, 0.0 }
 0x1ec   : > { %842 = vadd.xlane.f32.xlu1 %v841_v49  ;;  %830 = vadd.xlane.f32.xlu0 %v829_v51 }
 0x1f0   : > { %941 = vadd.xlane.f32.xlu1 %v940_v52  ;;  %929 = vadd.xlane.f32.xlu0 %v928_v54 }
 0x1f4   : > { %1040 = vadd.xlane.f32.xlu1 %v1039_v55  ;;  %1028 = vadd.xlane.f32.xlu0 %v1027_v57 }
 0x1f8   : > { %1139 = vadd.xlane.f32.xlu1 %v1138_v58  ;;  %1127 = vadd.xlane.f32.xlu0 %v1126_v59 }
 0x269   : > { %v534_v60 = vpop.xlane.xlu1 %533  ;;  %v435_v61 = vpop.xlane.xlu0 %434 }
 0x26a   : > { %v535_v62 = vrot.slane %v534_v60, 4  ;;  %v436_v63 = vrot.slane %v435_v61, 4 }
 0x26c   : > { %v536_v0 = vadd.f32 %v535_v62, %v534_v60  ;;  %v437_v1 = vadd.f32 %v436_v63, %v435_v61 }
 0x26d   : > { %v546_v2 = vpop.xlane.xlu1 %545  ;;  %v447_v3 = vpop.xlane.xlu0 %446 }
 0x26e   : > { %v537_v4 = vrot.slane %v536_v0, 2  ;;  %v438_v5 = vrot.slane %v437_v1, 2  ;;  %v547_v6 = vrot.slane %v546_v2, 4  ;;  %v448_v7 = vrot.slane %v447_v3, 4 }
 0x270   : > { %v548_v8 = vadd.f32 %v547_v6, %v546_v2  ;;  %v449_v9 = vadd.f32 %v448_v7, %v447_v3  ;;  %v439_v10 = vadd.f32 %v438_v5, %v437_v1  ;;  %v538_v13 = vadd.f32 %v537_v4, %v536_v0 }
 0x271   : > { %v645_v11 = vpop.xlane.xlu1 %644  ;;  %v633_v12 = vpop.xlane.xlu0 %632 }
 0x272   : > { %v549_v14 = vrot.slane %v548_v8, 2  ;;  %v450_v15 = vrot.slane %v449_v9, 2  ;;  %v646_v16 = vrot.slane %v645_v11, 4  ;;  %v634_v17 = vrot.slane %v633_v12, 4 }
 0x273   : > { %v440_v18 = vrot.slane %v439_v10, 1  ;;  %v539_v26 = vrot.slane %v538_v13, 1 }
 0x274   : > { %v647_v19 = vadd.f32 %v646_v16, %v645_v11  ;;  %v635_v20 = vadd.f32 %v634_v17, %v633_v12  ;;  %v451_v21 = vadd.f32 %v450_v15, %v449_v9  ;;  %v550_v22 = vadd.f32 %v549_v14, %v548_v8 }
 0x275   : > { %v744_v23 = vpop.xlane.xlu1 %743  ;;  %v732_v24 = vpop.xlane.xlu0 %731  ;;  %v441_v25 = vadd.f32 %v440_v18, %v439_v10  ;;  %v540_v40 = vadd.f32 %v539_v26, %v538_v13 }
 0x276   : > { %v648_v27 = vrot.slane %v647_v19, 2  ;;  %v636_v28 = vrot.slane %v635_v20, 2  ;;  %v745_v29 = vrot.slane %v744_v23, 4  ;;  %v733_v30 = vrot.slane %v732_v24, 4 }
 0x277   : > { %1451 = vpush %v441_v25  ;;  %v452_v31 = vrot.slane %v451_v21, 1  ;;  %v551_v32 = vrot.slane %v550_v22, 1 }
 0x278   : > { %v746_v33 = vadd.f32 %v745_v29, %v744_v23  ;;  %v734_v34 = vadd.f32 %v733_v30, %v732_v24  ;;  %v637_v35 = vadd.f32 %v636_v28, %v635_v20  ;;  %v649_v36 = vadd.f32 %v648_v27, %v647_v19 }
 0x279   : > { %v843_v37 = vpop.xlane.xlu1 %842  ;;  %v831_v38 = vpop.xlane.xlu0 %830  ;;  %v453_v39 = vadd.f32 %v452_v31, %v451_v21  ;;  %v552_v41 = vadd.f32 %v551_v32, %v550_v22 }
 0x27a   : > { %v747_v42 = vrot.slane %v746_v33, 2  ;;  %v735_v43 = vrot.slane %v734_v34, 2  ;;  %v844_v44 = vrot.slane %v843_v37, 4  ;;  %v832_v45 = vrot.slane %v831_v38, 4 }
 0x27b   : > { %1453 = vpush %v453_v39  ;;  %v638_v46 = vrot.slane %v637_v35, 1  ;;  %v650_v47 = vrot.slane %v649_v36, 1 }
 0x27c   : > { %v845_v48 = vadd.f32 %v844_v44, %v843_v37  ;;  %v833_v49 = vadd.f32 %v832_v45, %v831_v38  ;;  %1455 = vpush %v540_v40  ;;  %v736_v50 = vadd.f32 %v735_v43, %v734_v34  ;;  %v748_v51 = vadd.f32 %v747_v42, %v746_v33  ;;  %v1149_v44 = vld [vmem:[%s1701_s15] sm:$0x1]  ;;  %v1153_v45 = vld [vmem:[%s1701_s15 + $0x1] sm:$0x1] }
 0x27d   : > { %1457 = vpush %v552_v41  ;;  %v942_v52 = vpop.xlane.xlu1 %941  ;;  %v930_v53 = vpop.xlane.xlu0 %929  ;;  %v639_v54 = vadd.f32 %v638_v46, %v637_v35  ;;  %v651_v55 = vadd.f32 %v650_v47, %v649_v36 }
 0x27e   : > { %v846_v56 = vrot.slane %v845_v48, 2  ;;  %v834_v57 = vrot.slane %v833_v49, 2  ;;  %v943_v58 = vrot.slane %v942_v52, 4  ;;  %v931_v59 = vrot.slane %v930_v53, 4 }
 0x27f   : > { %1459 = vpush %v639_v54  ;;  %v737_v60 = vrot.slane %v736_v50, 1  ;;  %v749_v61 = vrot.slane %v748_v51, 1  ;;  %v1221_v54 = vld [vmem:[%s1703_s5 + $0x20] sm:$0xff] (%p1672_p5) }
 0x280   : > { %v944_v62 = vadd.f32 %v943_v58, %v942_v52  ;;  %v932_v63 = vadd.f32 %v931_v59, %v930_v53  ;;  %1461 = vpush %v651_v55  ;;  %v835_v0 = vadd.f32 %v834_v57, %v833_v49  ;;  %v847_v1 = vadd.f32 %v846_v56, %v845_v48  ;;  %v1217_v52 = vld [vmem:[%s1703_s5 + $0x10] sm:$0xff] (%p1672_p5)  ;;  %v1219_v53 = vld [vmem:[%s1703_s5 + $0x18] sm:$0xff] (%p1672_p5)  ;;  %v1223_v55 = vld [vmem:[%s1703_s5 + $0x28] sm:$0xff] (%p1672_p5) }
 0x281   : > { %v1041_v2 = vpop.xlane.xlu1 %1040  ;;  %v1029_v3 = vpop.xlane.xlu0 %1028  ;;  %v738_v4 = vadd.f32 %v737_v60, %v736_v50  ;;  %v750_v5 = vadd.f32 %v749_v61, %v748_v51  ;;  %v1213_v50 = vld [vmem:[%s1703_s5] sm:$0xff] (%p1672_p5)  ;;  %v1215_v51 = vld [vmem:[%s1703_s5 + $0x8] sm:$0xff] (%p1672_p5)  ;;  %v1225_v56 = vld [vmem:[%s1703_s5 + $0x30] sm:$0xff] (%p1672_p5) }
 0x282   : > { %v945_v6 = vrot.slane %v944_v62, 2  ;;  %v933_v7 = vrot.slane %v932_v63, 2  ;;  %v1042_v8 = vrot.slane %v1041_v2, 4  ;;  %v1030_v9 = vrot.slane %v1029_v3, 4  ;;  %v1227_v57 = vld [vmem:[%s1703_s5 + $0x38] sm:$0xff] (%p1672_p5) }
 0x283   : > { %1463 = vpush %v738_v4  ;;  %v836_v10 = vrot.slane %v835_v0, 1  ;;  %v848_v11 = vrot.slane %v847_v1, 1 }
 0x284   : > { %v1043_v12 = vadd.f32 %v1042_v8, %v1041_v2  ;;  %v1031_v13 = vadd.f32 %v1030_v9, %v1029_v3  ;;  %1465 = vpush %v750_v5  ;;  %v934_v14 = vadd.f32 %v933_v7, %v932_v63  ;;  %v946_v15 = vadd.f32 %v945_v6, %v944_v62 }
 0x285   : > { %v1140_v16 = vpop.xlane.xlu1 %1139  ;;  %v1128_v17 = vpop.xlane.xlu0 %1127  ;;  %v837_v18 = vadd.f32 %v836_v10, %v835_v0  ;;  %v849_v19 = vadd.f32 %v848_v11, %v847_v1 }
 0x286   : > { %v1044_v20 = vrot.slane %v1043_v12, 2  ;;  %v1032_v21 = vrot.slane %v1031_v13, 2  ;;  %v1141_v22 = vrot.slane %v1140_v16, 4  ;;  %v1129_v23 = vrot.slane %v1128_v17, 4 }
 0x287   : > { %1467 = vpush %v837_v18  ;;  %v935_v24 = vrot.slane %v934_v14, 1  ;;  %v947_v25 = vrot.slane %v946_v15, 1 }
 0x288   : > { %v1142_v26 = vadd.f32 %v1141_v22, %v1140_v16  ;;  %v1130_v27 = vadd.f32 %v1129_v23, %v1128_v17  ;;  %1469 = vpush %v849_v19  ;;  %v1033_v28 = vadd.f32 %v1032_v21, %v1031_v13  ;;  %v1045_v29 = vadd.f32 %v1044_v20, %v1043_v12 }
 0x289   : > { %v936_v30 = vadd.f32 %v935_v24, %v934_v14  ;;  %v948_v31 = vadd.f32 %v947_v25, %v946_v15 }
 0x28a   : > { %v1143_v32 = vrot.slane %v1142_v26, 2  ;;  %v1131_v33 = vrot.slane %v1130_v27, 2  ;;  %v1034_v34 = vrot.slane %v1033_v28, 1  ;;  %v1046_v35 = vrot.slane %v1045_v29, 1 }
 0x28b   : > { %1471 = vpush %v936_v30 }
 0x28c   : > { %v1144_v36 = vadd.f32 %v1143_v32, %v1142_v26  ;;  %v1132_v37 = vadd.f32 %v1131_v33, %v1130_v27  ;;  %1473 = vpush %v948_v31  ;;  %v1035_v38 = vadd.f32 %v1034_v34, %v1033_v28  ;;  %v1047_v39 = vadd.f32 %v1046_v35, %v1045_v29 }
 0x28e   : > { %1475 = vpush %v1035_v38  ;;  %v1133_v40 = vrot.slane %v1132_v37, 1  ;;  %v1145_v41 = vrot.slane %v1144_v36, 1 }
 0x28f   : > { %1477 = vpush %v1047_v39 }
 0x290   : > { %v1134_v42 = vadd.f32 %v1133_v40, %v1132_v37  ;;  %v1146_v43 = vadd.f32 %v1145_v41, %v1144_v36 }
 0x292   : > { %1479 = vpush %v1134_v42 }
 0x293   : > { %1481 = vpush %v1146_v43 }
 0x2a8   : > { %s1452_s6 = spop %1451 }
 0x2ac   : > { %s1454_s8 = spop %1453 }
 0x2ad   : > { %s1456_s9 = spop %1455 }
 0x2ae   : > { %s1458_s11 = spop %1457  ;;  %s542_s24 = sadd.f32 %s1456_s9, %s1452_s6 }
 0x2af   : > { %s554_s27 = sadd.f32 %s1458_s11, %s1454_s8 }
 0x2b0   : > { %s1460_s12 = spop %1459 }
 0x2b1   : > { %s1462_s13 = spop %1461  ;;  %s641_s29 = sadd.f32 %s1460_s12, %s542_s24 }
 0x2b2   : > { %s653_s7 = sadd.f32 %s1462_s13, %s554_s27 }
 0x2b4   : > { %s1464_s14 = spop %1463 }
 0x2b5   : > { %s1466_s25 = spop %1465  ;;  %s740_s0 = sadd.f32 %s1464_s14, %s641_s29 }
 0x2b6   : > { %s752_s2 = sadd.f32 %s1466_s25, %s653_s7 }
 0x2b8   : > { %s1468_s28 = spop %1467 }
 0x2b9   : > { %s1470_s10 = spop %1469  ;;  %s839_s4 = sadd.f32 %s1468_s28, %s740_s0 }
 0x2ba   : > { %s851_s22 = sadd.f32 %s1470_s10, %s752_s2  ;;  %s1375_s0 = sshll.u32 (%p1672_p5), %s1584_s18, 4 }
 0x2bc   : > { %s1472_s1 = spop %1471 }
 0x2bd   : > { %s1474_s23 = spop %1473  ;;  %s938_s19 = sadd.f32 %s1472_s1, %s839_s4 }
 0x2be   : > { %s950_s6 = sadd.f32 %s1474_s23, %s851_s22  ;;  %s1169_s1 = sadd.s32 (%p1672_p5), %s1580_s17, %s1375_s0 }
 0x2bf   : > { %s1476_s20 = spop %1475  ;;  %s1376_s2 = sshll.u32 (%p1672_p5), %s1169_s1, 3 }
 0x2c0   : > { %s1478_s30 = spop %1477  ;;  %s1037_s9 = sadd.f32 %s1476_s20, %s938_s19 }
 0x2c1   : > { %s1049_s8 = sadd.f32 %s1478_s30, %s950_s6  ;;  %s1171_s20 = scalar_lea.vmem (%p1672_p5), %s1810_s3, %s1376_s2 }
 0x2c2   : > { %1214 = vst [vmem:[%s1171_s20] sm:$0xff] (%p1672_p5), %v1213_v50  ;;  %1216 = vst [vmem:[%s1171_s20 + $0x10] sm:$0xff] (%p1672_p5), %v1215_v51 }
 0x2c3   : > { %s1480_s11 = spop %1479  ;;  %1218 = vst [vmem:[%s1171_s20 + $0x20] sm:$0xff] (%p1672_p5), %v1217_v52  ;;  %1220 = vst [vmem:[%s1171_s20 + $0x30] sm:$0xff] (%p1672_p5), %v1219_v53 }
 0x2c4   : > { %s1136_s12 = sadd.f32 %s1480_s11, %s1037_s9  ;;  %s1482_s13 = spop %1481  ;;  %1222 = vst [vmem:[%s1171_s20 + $0x40] sm:$0xff] (%p1672_p5), %v1221_v54  ;;  %1224 = vst [vmem:[%s1171_s20 + $0x50] sm:$0xff] (%p1672_p5), %v1223_v55 }
 0x2c5   : > { %s1148_s24 = sadd.f32 %s1482_s13, %s1049_s8  ;;  %1167 = sbr.rel (!%p1672_p5) target bundleno = 716 (0x2cc), region = 40  ;;  %1226 = vst [vmem:[%s1171_s20 + $0x60] sm:$0xff] (%p1672_p5), %v1225_v56  ;;  %1228 = vst [vmem:[%s1171_s20 + $0x70] sm:$0xff] (%p1672_p5), %v1227_v57 }
 0x2c6   : > { %v1150_v46 = vstv %s1136_s12 }
 0x2c7   : > { %v1151_v47 = vadd.f32 %v1150_v46, %v1149_v44  ;;  %v1154_v48 = vstv %s1148_s24 }
 0x2c8   : > { %v1155_v49 = vadd.f32 %v1154_v48, %v1153_v45 }
 0x2c9   : > { %1152 = vst [vmem:[%s1701_s15] sm:$0x1] %v1151_v47 }
 0x2ca   : > { %1156 = vst [vmem:[%s1701_s15 + $0x1] sm:$0x1] %v1155_v49 }
 0x2cc PF: > { %s15_s21 = sadd.s32 1, %s1596_s21   ;;  %s1830_s17 = sld [smem:[#allocation8_spill]] }
 0x2cd   : > { %p12_p12 = scmp.ge.s32.totalorder %s15_s21, 6   ;;  %s1831_s18 = sld [smem:[#allocation4_spill]] }
 0x2ce   : > { %s1832_s22 = sld [smem:[#allocation5_spill]]  ;;  %s1833_s19 = sld [smem:[#allocation6_spill]] }
 0x2cf   : > { %s1834_s20 = sld [smem:[#allocation7_spill]]  ;;  %s1835_s15 = smov %s1576_s16 }
 0x2d0   :  { %14 = sbr.rel (!%p12_p12) target bundleno = 9 (0x9), region = 126 }
 0x2d2   : > { %s1836_s16 = smov %s1830_s17 }
 0x2d3   : > { %s1837_s17 = smov %s1831_s18 }
 0x2d4   : > { %s1838_s18 = smov %s1832_s22 }

</bundles_post_ra>
